<compile_context>
chip_gen: v7x
topology: tpu7x:2x2x1
jax: 0.10.0
libtpu: 0.0.40
codegen_flags: <defaults>
</compile_context>

<pallas_src>
import jax
import jax.numpy as jnp
from jax import lax
from jax.experimental import pallas as pl
from jax.experimental.pallas import tpu as pltpu


# ----------------------------------------------------------------------------
# Fused kernel: DoubleConv (+ReLU) + full 2x2 max-pool for one image
# ----------------------------------------------------------------------------
def _downsample_kernel(x_ref, w1_ref, b1_ref, w2_ref, b2_ref, o_ref, pool_ref):
    """
    x_ref : (1, H, W, Cin)  bf16, unpadded NHWC tile (padding done in VMEM)
    w1_ref: (9*Cin, C1) bf16    b1_ref: (1, C1) f32
    w2_ref: (9*C1,  C2) bf16    b2_ref: (1, C2) f32
    o_ref : (1, H//2, W//2, C2) out dtype   (fully 2x2 max-pooled)
    pool_ref: VMEM scratch ((H//2)*W, C2) f32
    """
    _, H, W, Cin = x_ref.shape
    C1 = w1_ref.shape[1]
    C2 = w2_ref.shape[1]

    def pad_hw(t):
        # zero-pad H and W by 1 on each side, entirely in VMEM (bf16)
        h, w, c = t.shape
        zr = jnp.zeros((1, w, c), t.dtype)
        t = jnp.concatenate([zr, t, zr], axis=0)          # (h+2, w,   c)
        zc = jnp.zeros((h + 2, 1, c), t.dtype)
        return jnp.concatenate([zc, t, zc], axis=1)       # (h+2, w+2, c)

    def conv3x3_relu(xpad, w_ref, b_ref):
        # im2col in VMEM: 9 shifted bf16 views -> (H, W, 9C) -> ONE big-M matmul
        # (H*W, 9C) @ (9C, Co) on the MXU with f32 accumulation.
        c = xpad.shape[-1]
        taps = [xpad[ky:ky + H, kx:kx + W, :]
                for ky in range(3) for kx in range(3)]
        patch = jnp.concatenate(taps, axis=-1).reshape(H * W, 9 * c)   # bf16
        acc = jnp.dot(patch, w_ref[...], preferred_element_type=jnp.float32)
        return jnp.maximum(acc + b_ref[...], 0.0)          # (H*W, Co) f32

    x = x_ref[0]                                           # (H, W, Cin) bf16

    # conv1 + ReLU; inter-layer activation stays in VMEM as bf16
    y1 = conv3x3_relu(pad_hw(x), w1_ref, b1_ref)           # (H*W, C1) f32
    y1 = y1.astype(jnp.bfloat16).reshape(H, W, C1)         # bf16 before re-padding

    # conv2 + ReLU
    y2 = conv3x3_relu(pad_hw(y1), w2_ref, b2_ref)          # (H*W, C2) f32

    # ---- fused 2x2 max-pool -------------------------------------------------
    # H-direction: rows are ordered h*W + w, so a leading-dim split pairs rows
    # (2a, 2a+1) for free; max the two slices.
    g = y2.reshape(H // 2, 2, W, C2)
    yh = jnp.maximum(g[:, 0], g[:, 1])                     # (H//2, W, C2) f32

    # W-direction: stage in VMEM, then stride-2 sublane loads pick even/odd cols
    # (flat row index q = a*W + w; q even <=> w even since W is even).
    pool_ref[...] = yh.reshape((H // 2) * W, C2)
    npool = (H // 2) * (W // 2)
    even = pool_ref[pl.ds(0, npool, stride=2), :]
    odd = pool_ref[pl.ds(1, npool, stride=2), :]
    out = jnp.maximum(even, odd).reshape(H // 2, W // 2, C2)

    # single vectorized writeback
    o_ref[0] = out.astype(o_ref.dtype)


# ----------------------------------------------------------------------------
# Wrapper (NCHW in / NCHW out, like the PyTorch module)
# ----------------------------------------------------------------------------
def downsample_forward(x_nchw, params, out_dtype=jnp.float32):
    """DownSample: DoubleConv(in->out, 3x3+ReLU x2) then MaxPool2d(2, 2)."""
    x = jnp.transpose(x_nchw, (0, 2, 3, 1))                # NCHW -> NHWC
    N, H, W, Cin = x.shape
    assert H % 2 == 0 and W % 2 == 0, "2x2 pool needs even H and W"
    C1 = params["c1_w"].shape[0]
    C2 = params["c2_w"].shape[0]

    xb = x.astype(jnp.bfloat16)                            # unpadded; kernel pads

    # (Cout, Cin, 3, 3) -> (ky, kx, ci, co) -> (9*Cin, Cout); row = (ky*3+kx)*Cin+ci
    w1 = jnp.transpose(params["c1_w"], (2, 3, 1, 0)).reshape(9 * Cin, C1).astype(jnp.bfloat16)
    w2 = jnp.transpose(params["c2_w"], (2, 3, 1, 0)).reshape(9 * C1, C2).astype(jnp.bfloat16)
    b1 = params["c1_b"].reshape(1, C1).astype(jnp.float32)
    b2 = params["c2_b"].reshape(1, C2).astype(jnp.float32)

    y = pl.pallas_call(
        _downsample_kernel,
        out_shape=jax.ShapeDtypeStruct((N, H // 2, W // 2, C2), out_dtype),
        grid=(N,),
        in_specs=[
            pl.BlockSpec((1, H, W, Cin), lambda n: (n, 0, 0, 0)),
            pl.BlockSpec((9 * Cin, C1), lambda n: (0, 0)),
            pl.BlockSpec((1, C1), lambda n: (0, 0)),
            pl.BlockSpec((9 * C1, C2), lambda n: (0, 0)),
            pl.BlockSpec((1, C2), lambda n: (0, 0)),
        ],
        out_specs=pl.BlockSpec((1, H // 2, W // 2, C2), lambda n: (n, 0, 0, 0)),
        scratch_shapes=[pltpu.VMEM(((H // 2) * W, C2), jnp.float32)],
        compiler_params=pltpu.CompilerParams(
            dimension_semantics=("parallel",),
            # safe on all generations (v7x scoped default); raise toward ~96 MiB only
            # on v5e/v6e if larger row tiles are ever used.
            vmem_limit_bytes=32 * 1024 * 1024,
        ),
    )(xb, w1, b1, w2, b2)

    return jnp.transpose(y, (0, 3, 1, 2))                  # NHWC -> NCHW


# ----------------------------------------------------------------------------
# Pure-JAX reference (f32) for correctness check
# ----------------------------------------------------------------------------
def _reference_forward(x_nchw, params):
    x = jnp.transpose(x_nchw, (0, 2, 3, 1))

    def conv_ref(z, w_oihw, b):
        w_hwio = jnp.transpose(w_oihw, (2, 3, 1, 0))
        y = lax.conv_general_dilated(
            z, w_hwio, window_strides=(1, 1), padding="SAME",
            dimension_numbers=("NHWC", "HWIO", "NHWC"),
            precision=lax.Precision.HIGHEST)
        return jnp.maximum(y + b, 0.0)

    t = conv_ref(x, params["c1_w"], params["c1_b"])
    t = conv_ref(t, params["c2_w"], params["c2_b"])
    t = jnp.maximum(jnp.maximum(t[:, 0::2, 0::2, :], t[:, 0::2, 1::2, :]),
                    jnp.maximum(t[:, 1::2, 0::2, :], t[:, 1::2, 1::2, :]))
    return jnp.transpose(t, (0, 3, 1, 2))


# ----------------------------------------------------------------------------
# Main
# ----------------------------------------------------------------------------
if __name__ == "__main__":
    in_channels, out_channels = 4, 8
    N, H, W = 2, 16, 16

    key = jax.random.PRNGKey(0)
    k = jax.random.split(key, 5)
    params = {
        "c1_w": 0.1 * jax.random.normal(k[0], (out_channels, in_channels, 3, 3), jnp.float32),
        "c1_b": 0.1 * jax.random.normal(k[1], (out_channels,), jnp.float32),
        "c2_w": 0.1 * jax.random.normal(k[2], (out_channels, out_channels, 3, 3), jnp.float32),
        "c2_b": 0.1 * jax.random.normal(k[3], (out_channels,), jnp.float32),
    }
    x = jax.random.normal(k[4], (N, in_channels, H, W), jnp.float32)   # NCHW input

    out = jax.block_until_ready(jax.jit(downsample_forward)(x, params))
    assert out.shape == (N, out_channels, H // 2, W // 2), out.shape

    ref = jax.block_until_ready(_reference_forward(x, params))
    max_err = float(jnp.max(jnp.abs(out - ref)))
    # bf16 MXU inputs / bf16 inter-layer activation with f32 accumulation vs pure-f32 ref
    assert jnp.allclose(out, ref, atol=2e-2, rtol=2e-2), max_err

    print("KERNEL_OK")
</pallas_src>

<mosaic_0001>
module attributes {stable_mosaic.version = 11 : i64} {
  func.func @_downsample_kernel(%arg0: i32, %arg1: memref<1x16x16x4xbf16, #tpu.memory_space<vmem>>, %arg2: memref<36x8xbf16, #tpu.memory_space<vmem>>, %arg3: memref<1x8xf32, #tpu.memory_space<vmem>>, %arg4: memref<72x8xbf16, #tpu.memory_space<vmem>>, %arg5: memref<1x8xf32, #tpu.memory_space<vmem>>, %arg6: memref<1x8x8x8xf32, #tpu.memory_space<vmem>>, %arg7: memref<128x8xf32, #tpu.memory_space<vmem>>) attributes {dimension_semantics = [#tpu.dimension_semantics<parallel>], iteration_bounds = array<i64: 2>, scalar_prefetch = 0 : i64, scratch_operands = 1 : i64, tpu.core_type = #tpu.core_type<tc>, window_params = [{transform_indices = @transform_0, window_bounds = array<i64: 1, 16, 16, 4>}, {pipeline_mode = #tpu.pipeline_mode<synchronous>, transform_indices = @transform_1, window_bounds = array<i64: 36, 8>}, {pipeline_mode = #tpu.pipeline_mode<synchronous>, transform_indices = @transform_2, window_bounds = array<i64: 1, 8>}, {pipeline_mode = #tpu.pipeline_mode<synchronous>, transform_indices = @transform_3, window_bounds = array<i64: 72, 8>}, {pipeline_mode = #tpu.pipeline_mode<synchronous>, transform_indices = @transform_4, window_bounds = array<i64: 1, 8>}, {transform_indices = @transform_5, window_bounds = array<i64: 1, 8, 8, 8>}]} {
    %c0 = arith.constant 0 : index
    %c0_0 = arith.constant 0 : index
    %c0_1 = arith.constant 0 : index
    %c0_2 = arith.constant 0 : index
    %0 = vector.load %arg1[%c0, %c0_0, %c0_1, %c0_2] : memref<1x16x16x4xbf16, #tpu.memory_space<vmem>>, vector<1x16x16x4xbf16>
    %1 = vector.shape_cast %0 : vector<1x16x16x4xbf16> to vector<16x16x4xbf16>
    %cst = arith.constant 0.000000e+00 : bf16
    %2 = vector.broadcast %cst : bf16 to vector<1x16x4xbf16>
    %3 = tpu.concatenate %2, %1, %2 in 0 : vector<1x16x4xbf16>, vector<16x16x4xbf16>, vector<1x16x4xbf16> -> vector<18x16x4xbf16>
    %cst_3 = arith.constant 0.000000e+00 : bf16
    %4 = vector.broadcast %cst_3 : bf16 to vector<18x1x4xbf16>
    %5 = tpu.concatenate %4, %3, %4 in 1 : vector<18x1x4xbf16>, vector<18x16x4xbf16>, vector<18x1x4xbf16> -> vector<18x18x4xbf16>
    %6 = vector.extract_strided_slice %5 {offsets = [0, 0, 0], sizes = [16, 16, 4], strides = [1, 1, 1]} : vector<18x18x4xbf16> to vector<16x16x4xbf16>
    %7 = vector.extract_strided_slice %5 {offsets = [0, 1, 0], sizes = [16, 16, 4], strides = [1, 1, 1]} : vector<18x18x4xbf16> to vector<16x16x4xbf16>
    %8 = vector.extract_strided_slice %5 {offsets = [0, 2, 0], sizes = [16, 16, 4], strides = [1, 1, 1]} : vector<18x18x4xbf16> to vector<16x16x4xbf16>
    %9 = vector.extract_strided_slice %5 {offsets = [1, 0, 0], sizes = [16, 16, 4], strides = [1, 1, 1]} : vector<18x18x4xbf16> to vector<16x16x4xbf16>
    %10 = vector.extract_strided_slice %5 {offsets = [1, 1, 0], sizes = [16, 16, 4], strides = [1, 1, 1]} : vector<18x18x4xbf16> to vector<16x16x4xbf16>
    %11 = vector.extract_strided_slice %5 {offsets = [1, 2, 0], sizes = [16, 16, 4], strides = [1, 1, 1]} : vector<18x18x4xbf16> to vector<16x16x4xbf16>
    %12 = vector.extract_strided_slice %5 {offsets = [2, 0, 0], sizes = [16, 16, 4], strides = [1, 1, 1]} : vector<18x18x4xbf16> to vector<16x16x4xbf16>
    %13 = vector.extract_strided_slice %5 {offsets = [2, 1, 0], sizes = [16, 16, 4], strides = [1, 1, 1]} : vector<18x18x4xbf16> to vector<16x16x4xbf16>
    %14 = vector.extract_strided_slice %5 {offsets = [2, 2, 0], sizes = [16, 16, 4], strides = [1, 1, 1]} : vector<18x18x4xbf16> to vector<16x16x4xbf16>
    %15 = tpu.concatenate %6, %7, %8, %9, %10, %11, %12, %13, %14 in 2 : vector<16x16x4xbf16>, vector<16x16x4xbf16>, vector<16x16x4xbf16>, vector<16x16x4xbf16>, vector<16x16x4xbf16>, vector<16x16x4xbf16>, vector<16x16x4xbf16>, vector<16x16x4xbf16>, vector<16x16x4xbf16> -> vector<16x16x36xbf16>
    %16 = vector.shape_cast %15 : vector<16x16x36xbf16> to vector<256x36xbf16>
    %c0_4 = arith.constant 0 : index
    %c0_5 = arith.constant 0 : index
    %17 = vector.load %arg2[%c0_4, %c0_5] : memref<36x8xbf16, #tpu.memory_space<vmem>>, vector<36x8xbf16>
    %cst_6 = arith.constant dense<0.000000e+00> : vector<256x8xf32>
    %18 = tpu.matmul %16, %17, %cst_6 {dimension_numbers = #tpu.dot_dimension_numbers<[1], [0], [0], [1], [0, 0, 1, 1], [], []>} : vector<256x36xbf16>, vector<36x8xbf16>, vector<256x8xf32> -> vector<256x8xf32>
    %c0_7 = arith.constant 0 : index
    %c0_8 = arith.constant 0 : index
    %19 = vector.load %arg3[%c0_7, %c0_8] : memref<1x8xf32, #tpu.memory_space<vmem>>, vector<1x8xf32>
    %20 = vector.broadcast %19 : vector<1x8xf32> to vector<256x8xf32>
    %21 = arith.addf %18, %20 : vector<256x8xf32>
    %cst_9 = arith.constant 0.000000e+00 : f32
    %22 = vector.broadcast %cst_9 : f32 to vector<256x8xf32>
    %23 = arith.maximumf %21, %22 : vector<256x8xf32>
    %24 = arith.truncf %23 : vector<256x8xf32> to vector<256x8xbf16>
    %25 = vector.shape_cast %24 : vector<256x8xbf16> to vector<16x16x8xbf16>
    %cst_10 = arith.constant 0.000000e+00 : bf16
    %26 = vector.broadcast %cst_10 : bf16 to vector<1x16x8xbf16>
    %27 = tpu.concatenate %26, %25, %26 in 0 : vector<1x16x8xbf16>, vector<16x16x8xbf16>, vector<1x16x8xbf16> -> vector<18x16x8xbf16>
    %cst_11 = arith.constant 0.000000e+00 : bf16
    %28 = vector.broadcast %cst_11 : bf16 to vector<18x1x8xbf16>
    %29 = tpu.concatenate %28, %27, %28 in 1 : vector<18x1x8xbf16>, vector<18x16x8xbf16>, vector<18x1x8xbf16> -> vector<18x18x8xbf16>
    %30 = vector.extract_strided_slice %29 {offsets = [0, 0, 0], sizes = [16, 16, 8], strides = [1, 1, 1]} : vector<18x18x8xbf16> to vector<16x16x8xbf16>
    %31 = vector.extract_strided_slice %29 {offsets = [0, 1, 0], sizes = [16, 16, 8], strides = [1, 1, 1]} : vector<18x18x8xbf16> to vector<16x16x8xbf16>
    %32 = vector.extract_strided_slice %29 {offsets = [0, 2, 0], sizes = [16, 16, 8], strides = [1, 1, 1]} : vector<18x18x8xbf16> to vector<16x16x8xbf16>
    %33 = vector.extract_strided_slice %29 {offsets = [1, 0, 0], sizes = [16, 16, 8], strides = [1, 1, 1]} : vector<18x18x8xbf16> to vector<16x16x8xbf16>
    %34 = vector.extract_strided_slice %29 {offsets = [1, 1, 0], sizes = [16, 16, 8], strides = [1, 1, 1]} : vector<18x18x8xbf16> to vector<16x16x8xbf16>
    %35 = vector.extract_strided_slice %29 {offsets = [1, 2, 0], sizes = [16, 16, 8], strides = [1, 1, 1]} : vector<18x18x8xbf16> to vector<16x16x8xbf16>
    %36 = vector.extract_strided_slice %29 {offsets = [2, 0, 0], sizes = [16, 16, 8], strides = [1, 1, 1]} : vector<18x18x8xbf16> to vector<16x16x8xbf16>
    %37 = vector.extract_strided_slice %29 {offsets = [2, 1, 0], sizes = [16, 16, 8], strides = [1, 1, 1]} : vector<18x18x8xbf16> to vector<16x16x8xbf16>
    %38 = vector.extract_strided_slice %29 {offsets = [2, 2, 0], sizes = [16, 16, 8], strides = [1, 1, 1]} : vector<18x18x8xbf16> to vector<16x16x8xbf16>
    %39 = tpu.concatenate %30, %31, %32, %33, %34, %35, %36, %37, %38 in 2 : vector<16x16x8xbf16>, vector<16x16x8xbf16>, vector<16x16x8xbf16>, vector<16x16x8xbf16>, vector<16x16x8xbf16>, vector<16x16x8xbf16>, vector<16x16x8xbf16>, vector<16x16x8xbf16>, vector<16x16x8xbf16> -> vector<16x16x72xbf16>
    %40 = vector.shape_cast %39 : vector<16x16x72xbf16> to vector<256x72xbf16>
    %c0_12 = arith.constant 0 : index
    %c0_13 = arith.constant 0 : index
    %41 = vector.load %arg4[%c0_12, %c0_13] : memref<72x8xbf16, #tpu.memory_space<vmem>>, vector<72x8xbf16>
    %cst_14 = arith.constant dense<0.000000e+00> : vector<256x8xf32>
    %42 = tpu.matmul %40, %41, %cst_14 {dimension_numbers = #tpu.dot_dimension_numbers<[1], [0], [0], [1], [0, 0, 1, 1], [], []>} : vector<256x72xbf16>, vector<72x8xbf16>, vector<256x8xf32> -> vector<256x8xf32>
    %c0_15 = arith.constant 0 : index
    %c0_16 = arith.constant 0 : index
    %43 = vector.load %arg5[%c0_15, %c0_16] : memref<1x8xf32, #tpu.memory_space<vmem>>, vector<1x8xf32>
    %44 = vector.broadcast %43 : vector<1x8xf32> to vector<256x8xf32>
    %45 = arith.addf %42, %44 : vector<256x8xf32>
    %cst_17 = arith.constant 0.000000e+00 : f32
    %46 = vector.broadcast %cst_17 : f32 to vector<256x8xf32>
    %47 = arith.maximumf %45, %46 : vector<256x8xf32>
    %48 = vector.shape_cast %47 : vector<256x8xf32> to vector<8x2x16x8xf32>
    %49 = vector.extract_strided_slice %48 {offsets = [0, 0, 0, 0], sizes = [8, 1, 16, 8], strides = [1, 1, 1, 1]} : vector<8x2x16x8xf32> to vector<8x1x16x8xf32>
    %50 = vector.shape_cast %49 : vector<8x1x16x8xf32> to vector<8x16x8xf32>
    %51 = vector.extract_strided_slice %48 {offsets = [0, 1, 0, 0], sizes = [8, 1, 16, 8], strides = [1, 1, 1, 1]} : vector<8x2x16x8xf32> to vector<8x1x16x8xf32>
    %52 = vector.shape_cast %51 : vector<8x1x16x8xf32> to vector<8x16x8xf32>
    %53 = arith.maximumf %50, %52 : vector<8x16x8xf32>
    %54 = vector.shape_cast %53 : vector<8x16x8xf32> to vector<128x8xf32>
    %c0_18 = arith.constant 0 : index
    %c0_19 = arith.constant 0 : index
    %55 = vector.load %arg7[%c0_18, %c0_19] : memref<128x8xf32, #tpu.memory_space<vmem>>, vector<128x8xf32>
    tpu.vector_store %arg7[%c0_18, %c0_19], %54 {strides = array<i32>} : memref<128x8xf32, #tpu.memory_space<vmem>>, vector<128x8xf32>,
    %c0_20 = arith.constant 0 : index
    %c0_21 = arith.constant 0 : index
    %56 = tpu.strided_load %arg7[%c0_20, %c0_21] {strides = array<i32: 2, 1>} : memref<128x8xf32, #tpu.memory_space<vmem>>, vector<64x8xf32>
    %c1 = arith.constant 1 : index
    %c0_22 = arith.constant 0 : index
    %57 = tpu.strided_load %arg7[%c1, %c0_22] {strides = array<i32: 2, 1>} : memref<128x8xf32, #tpu.memory_space<vmem>>, vector<64x8xf32>
    %58 = arith.maximumf %56, %57 : vector<64x8xf32>
    %59 = vector.shape_cast %58 : vector<64x8xf32> to vector<8x8x8xf32>
    %c0_23 = arith.constant 0 : index
    %c0_24 = arith.constant 0 : index
    %c0_25 = arith.constant 0 : index
    %c0_26 = arith.constant 0 : index
    %60 = vector.load %arg6[%c0_23, %c0_24, %c0_25, %c0_26] : memref<1x8x8x8xf32, #tpu.memory_space<vmem>>, vector<1x8x8x8xf32>
    %61 = vector.shape_cast %60 : vector<1x8x8x8xf32> to vector<8x8x8xf32>
    %62 = vector.shape_cast %59 : vector<8x8x8xf32> to vector<1x8x8x8xf32>
    tpu.vector_store %arg6[%c0_23, %c0_24, %c0_25, %c0_26], %62 {strides = array<i32>} : memref<1x8x8x8xf32, #tpu.memory_space<vmem>>, vector<1x8x8x8xf32>,
    return
  }
  func.func @transform_0(%arg0: i32) -> (i32, i32, i32, i32) {
    %c0_i32 = arith.constant 0 : i32
    %c0_i32_0 = arith.constant 0 : i32
    %c0_i32_1 = arith.constant 0 : i32
    %c0_i32_2 = arith.constant 0 : i32
    return %arg0, %c0_i32, %c0_i32_0, %c0_i32_1 : i32, i32, i32, i32
  }
  func.func @transform_1(%arg0: i32) -> (i32, i32) {
    %c0_i32 = arith.constant 0 : i32
    %c0_i32_0 = arith.constant 0 : i32
    %c0_i32_1 = arith.constant 0 : i32
    return %c0_i32, %c0_i32_0 : i32, i32
  }
  func.func @transform_2(%arg0: i32) -> (i32, i32) {
    %c0_i32 = arith.constant 0 : i32
    %c0_i32_0 = arith.constant 0 : i32
    %c0_i32_1 = arith.constant 0 : i32
    return %c0_i32, %c0_i32_0 : i32, i32
  }
  func.func @transform_3(%arg0: i32) -> (i32, i32) {
    %c0_i32 = arith.constant 0 : i32
    %c0_i32_0 = arith.constant 0 : i32
    %c0_i32_1 = arith.constant 0 : i32
    return %c0_i32, %c0_i32_0 : i32, i32
  }
  func.func @transform_4(%arg0: i32) -> (i32, i32) {
    %c0_i32 = arith.constant 0 : i32
    %c0_i32_0 = arith.constant 0 : i32
    %c0_i32_1 = arith.constant 0 : i32
    return %c0_i32, %c0_i32_0 : i32, i32
  }
  func.func @transform_5(%arg0: i32) -> (i32, i32, i32, i32) {
    %c0_i32 = arith.constant 0 : i32
    %c0_i32_0 = arith.constant 0 : i32
    %c0_i32_1 = arith.constant 0 : i32
    %c0_i32_2 = arith.constant 0 : i32
    return %arg0, %c0_i32, %c0_i32_0, %c0_i32_1 : i32, i32, i32, i32
  }
}

</mosaic_0001>

<bundles_post_ra>
// kernel: downsample_forward.1
= control target key start
LH: loop header
LB: loop body
LE: loop exit
PB: predicated region body
PF: predicated region fallthrough
CT: control target
= control target key end

     0   :  { %s3273_s18 = smov 0   ;;  %s4568_s0 = inlined_call_operand.vmem [shape: bf16[2,16,16,4], index: 0, kind: input, shape index: {}]   ;;  %s4569_s1 = inlined_call_operand.vmem [shape: bf16[36,8], index: 1, kind: input, shape index: {}]   ;;  %s4570_s2 = inlined_call_operand.vmem [shape: f32[1,8], index: 2, kind: input, shape index: {}]   ;;  %s4571_s3 = inlined_call_operand.vmem [shape: bf16[72,8], index: 3, kind: input, shape index: {}]   ;;  %s4572_s4 = inlined_call_operand.vmem [shape: f32[1,8], index: 4, kind: input, shape index: {}]   ;;  %s4573_s5 = inlined_call_operand.vmem [shape: f32[2,8,8,8], index: 5, kind: output, shape index: {}]  }
   0x1 LB: > { %s2983_s19 = sadd.s32 4294967295, %s3228_s18   ;;  %p2987_p0 = scmp.ge.s32.totalorder %s3228_s18, 1  ;;  %s3228_s18 = sphi %s3273_s18, %s15_s18  }
   0x2   : > { %p187_p1 = scmp.lt.s32.totalorder %s3228_s18, 3 }
   0x4   : > { %p188_p2 = pnand %p2987_p0, %p187_p1 }
   0x5   : > { %vm491_vm0 = vcmask (!%p188_p2), 1040384   ;;  %vm492_vm1 = vsmask.f32 (!%p188_p2), 256  ;;  %v3230_v0 = vmov (!%p188_p2), 0   ;;  %p215_p3 = scmp.lt.s32.totalorder (!%p188_p2), %s2983_s19, 1  ;;  %vm785_vm3 = vcmask (!%p188_p2), 1046528  }
   0x6   : > { %191 = sbr.rel (%p188_p2) target bundleno = 1012 (0x3f4), region = 40  ;;  %v341_v1 = vrot.slane (!%p188_p2), %v3230_v0, 7  ;;  %vm3281_vm2 = vmand (!%p188_p2), %vm491_vm0, %vm492_vm1  ;;  %vm528_vm4 = vsmask.f32 (!%p188_p2), 7424  ;;  %s3231_s24 = smov (!%p188_p2), 8   ;;  %v3206_v42 = vld [vmem:[%s4569_s1] sm:$0xff] (!%p188_p2)  }
   0x7   : > { %s3232_s25 = smov (!%p188_p2), 4   ;;  %s3233_s26 = smov (!%p188_p2), 12   ;;  %3094 = vmatprep.subr.bf16.mxu0 (!%p188_p2), %v3206_v42  ;;  %v3208_v54 = vld [vmem:[%s4569_s1 + $0x8] sm:$0xff] (!%p188_p2)   ;;  %vm1399_vm5 = vcmask (!%p188_p2), 1041408   ;;  %vm1075_vm6 = vcmask (!%p188_p2), 31744   ;;  %vm1108_vm7 = vcmask (!%p188_p2), 64512  }
   0x8   : > { %v3287_v3 = vsel (!%p188_p2), %vm3281_vm2, 0, %v341_v1  ;;  %v511_v4 = vsel (!%p188_p2), %vm3281_vm2, %v341_v1, 0  ;;  %s3234_s29 = smov (!%p188_p2), 24   ;;  %3095 = vmatpush3.bf16.msra.mxu0 (!%p188_p2), %v3206_v42  ;;  %s3235_s7 = smov (!%p188_p2), 20   ;;  %vm1141_vm8 = vcmask (!%p188_p2), 97280   ;;  %vm1174_vm9 = vcmask (!%p188_p2), 130048  }
   0x9   : > { %v786_v5 = vrot.slane (!%p188_p2), %v3287_v3, 1  ;;  %v787_v6 = vrot.slane (!%p188_p2), %v511_v4, 1  ;;  %v530_v7 = vshrl.u32 (!%p188_p2), %v3287_v3, 16  ;;  %v532_v8 = vshll.u32 (!%p188_p2), %v3287_v3, 16  ;;  %3096 = vmatprep.subr.bf16.mxu0 (!%p188_p2), %v3208_v54  ;;  %s3236_s8 = smov (!%p188_p2), 16   ;;  %s3237_s9 = smov (!%p188_p2), 28  }
   0xa   : > { %v537_v9 = vshll.u32 (!%p188_p2), %v511_v4, 16  ;;  %s3238_s10 = smov (!%p188_p2), 32   ;;  %vm1207_vm10 = vcmask (!%p188_p2), 162816   ;;  %vm1240_vm11 = vcmask (!%p188_p2), 195584   ;;  %vm1273_vm12 = vcmask (!%p188_p2), 228352   ;;  %s3239_s15 = smov (!%p188_p2), 48  }
   0xb   : > { %v3298_v10 = vsel (!%p188_p2), %vm785_vm3, %v786_v5, %v787_v6  ;;  %v534_v11 = vrot.slane (!%p188_p2), %v532_v8, 1  ;;  %vm1306_vm13 = vcmask (!%p188_p2), 261120   ;;  %vm1366_vm14 = vcmask (!%p188_p2), 293888   ;;  %s3240_s16 = smov (!%p188_p2), 40   ;;  %s3241_s17 = smov (!%p188_p2), 64  }
   0xc   : > { %834 = vrot.lane.b32.xlu1 (!%p188_p2), %v3298_v10, %s3231_s24  ;;  %v539_v12 = vrot.slane (!%p188_p2), %v537_v9, 1  ;;  %3097 = vmatpush3.bf16.msra.mxu0 (!%p188_p2), %v3208_v54  ;;  %vm2652_vm15 = vcmask (!%p188_p2), 1043456   ;;  %vm2444_vm0 = vcmask (!%p188_p2), 326656   ;;  %vm2477_vm1 = vcmask (!%p188_p2), 392192  }
   0xd   : > { %s4577_s19 = smov (!%p215_p3, %s2983_s19), 1  ;;  %v535_v14 = vor.u32 %v534_v11, %v530_v7 }
   0xe   : > { %s3052_s20 = sshll.u32 %s4577_s19, 7 }
   0xf   : > { %s3303_s23 = scalar_lea.vmem %s4568_s0, %s3052_s20  ;;  %v3310_v18 = vsel %vm528_vm4, %v535_v14, %v539_v12  ;;  %s3242_s20 = smov 56  }
  0x10   : > { %v3197_v13 = vld [vmem:[%s3303_s23 + $0x8] sm:$0xff]   ;;  %v3198_v15 = vld [vmem:[%s3303_s23] sm:$0xff]   ;;  %v3199_v21 = vld [vmem:[%s3303_s23 + $0x10] sm:$0xff]   ;;  %721 = vrot.lane.b32.xlu0 %v3310_v18, %s3232_s25 }
  0x11   : > { %v353_v16 = vshrl.u32 %v3197_v13, 16  ;;  %v356_v17 = vshll.u32 %v3197_v13, 16  ;;  %v346_v19 = vshrl.u32 %v3198_v15, 16  ;;  %v349_v20 = vshll.u32 %v3198_v15, 16  ;;  %v3200_v53 = vld [vmem:[%s3303_s23 + $0x18] sm:$0xff]   ;;  %v3201_v8 = vld [vmem:[%s3303_s23 + $0x20] sm:$0xff]  }
  0x12   : > { %v360_v24 = vshrl.u32 %v3199_v21, 16  ;;  %v363_v25 = vshll.u32 %v3199_v21, 16  ;;  %v367_v62 = vshrl.u32 %v3200_v53, 16  ;;  %v370_v5 = vshll.u32 %v3200_v53, 16 }
  0x13   : > { %v355_v22 = vrot.slane %v353_v16, 7  ;;  %v348_v23 = vrot.slane %v346_v19, 7  ;;  %v374_v13 = vshrl.u32 %v3201_v8, 16  ;;  %v3209_v15 = vld [vmem:[%s4569_s1 + $0x10] ss:$0 sps:$4 sm:$0x33]  }
  0x14   : > { %v362_v28 = vrot.slane %v360_v24, 7  ;;  %v369_v4 = vrot.slane %v367_v62, 7  ;;  %3174 = vmatprep.subr.msk.bf16.mxu0 %vm1399_vm5, %v3209_v15 }
  0x15   : > { %v358_v26 = vor.u32 %v356_v17, %v355_v22  ;;  %v351_v27 = vor.u32 %v349_v20, %v348_v23  ;;  %v512_v29 = vsel %vm3281_vm2, %v348_v23, 0  ;;  %v513_v35 = vsel %vm3281_vm2, %v355_v22, 0 }
  0x16   : > { %v365_v32 = vor.u32 %v363_v25, %v362_v28  ;;  %v790_v34 = vrot.slane %v512_v29, 1  ;;  %v549_v39 = vshll.u32 %v512_v29, 16  ;;  %v793_v44 = vrot.slane %v513_v35, 1 }
  0x17   : > { %v3319_v30 = vsel %vm3281_vm2, 0, %v358_v26  ;;  %v3325_v31 = vsel %vm3281_vm2, 0, %v351_v27  ;;  %v561_v45 = vshll.u32 %v513_v35, 16  ;;  %v514_v52 = vsel %vm3281_vm2, %v362_v28, 0 }
  0x18   : > { %869 = vrot.lane.b32.xlu1 %v3319_v30, %s3233_s26  ;;  %867 = vrot.lane.b32.xlu0 %v3325_v31, %s3233_s26  ;;  %v789_v33 = vrot.slane %v3325_v31, 1  ;;  %v544_v36 = vshll.u32 %v3325_v31, 16  ;;  %v3335_v37 = vsel %vm3281_vm2, 0, %v365_v32  ;;  %v542_v38 = vshrl.u32 %v3325_v31, 16 }
  0x19   : > { %v556_v40 = vshll.u32 %v3319_v30, 16  ;;  %v792_v43 = vrot.slane %v3319_v30, 1  ;;  %v554_v47 = vshrl.u32 %v3319_v30, 16  ;;  %v568_v49 = vshll.u32 %v3335_v37, 16 }
  0x1a   : > { %v546_v41 = vrot.slane %v544_v36, 1  ;;  %v791_v46 = vsel %vm785_vm3, %v789_v33, %v790_v34  ;;  %v551_v51 = vrot.slane %v549_v39, 1  ;;  %v563_v56 = vrot.slane %v561_v45, 1  ;;  %v3202_v36 = vld [vmem:[%s3303_s23 + $0x28] sm:$0xff]  }
  0x1b   : > { %v558_v48 = vrot.slane %v556_v40, 1  ;;  %v794_v55 = vsel %vm785_vm3, %v792_v43, %v793_v44  ;;  %v566_v58 = vshrl.u32 %v3335_v37, 16  ;;  %v570_v59 = vrot.slane %v568_v49, 1  ;;  %v3203_v49 = vld [vmem:[%s3303_s23 + $0x30] sm:$0xff]  }
  0x1c   : > { %981 = vrot.lane.b32.xlu1 %v3335_v37, %s3234_s29  ;;  %979 = vrot.lane.b32.xlu0 %v3319_v30, %s3234_s29  ;;  %v547_v50 = vor.u32 %v546_v41, %v542_v38  ;;  %v573_v60 = vshll.u32 %v514_v52, 16  ;;  %v372_v7 = vor.u32 %v370_v5, %v369_v4  ;;  %v795_v9 = vrot.slane %v3335_v37, 1 }
  0x1d   : > { %v559_v57 = vor.u32 %v558_v48, %v554_v47  ;;  %v571_v0 = vor.u32 %v570_v59, %v566_v58  ;;  %v796_v11 = vrot.slane %v514_v52, 1  ;;  %v515_v17 = vsel %vm3281_vm2, %v369_v4, 0 }
  0x1e   : > { %v552_v61 = vsel %vm528_vm4, %v547_v50, %v551_v51  ;;  %v575_v1 = vrot.slane %v573_v60, 1  ;;  %v3373_v12 = vsel %vm3281_vm2, 0, %v372_v7  ;;  %v376_v19 = vrot.slane %v374_v13, 7 }
  0x1f   : > { %v564_v63 = vsel %vm528_vm4, %v559_v57, %v563_v56  ;;  %v580_v14 = vshll.u32 %v3373_v12, 16  ;;  %v797_v16 = vsel %vm785_vm3, %v795_v9, %v796_v11  ;;  %v377_v20 = vshll.u32 %v3201_v8, 16  ;;  %v3204_v9 = vld [vmem:[%s3303_s23 + $0x38] sm:$0xff]  }
  0x20   : > { %836 = vrot.lane.b32.xlu1 %v791_v46, %s3231_s24  ;;  %947 = vrot.lane.b32.xlu0 %v791_v46, %s3235_s7  ;;  %v576_v6 = vsel %vm528_vm4, %v571_v0, %v575_v1  ;;  %v578_v21 = vshrl.u32 %v3373_v12, 16  ;;  %v585_v23 = vshll.u32 %v515_v17, 16  ;;  %v1401_v25 = vsel %vm1399_vm5, %v3209_v15, 0 }
  0x21   : > { %v582_v22 = vrot.slane %v580_v14, 1  ;;  %v379_v24 = vor.u32 %v377_v20, %v376_v19  ;;  %3099 = vmatpush3.bf16.msra.mxu0 %v1401_v25  ;;  %v798_v32 = vrot.slane %v3373_v12, 1  ;;  %v799_v33 = vrot.slane %v515_v17, 1 }
  0x22   : > { %v587_v27 = vrot.slane %v585_v23, 1  ;;  %v516_v35 = vsel %vm3281_vm2, %v376_v19, 0  ;;  %v381_v42 = vshrl.u32 %v3202_v36, 16  ;;  %v384_v46 = vshll.u32 %v3202_v36, 16 }
  0x23   : > { %v583_v26 = vor.u32 %v582_v22, %v578_v21  ;;  %v3391_v28 = vsel %vm3281_vm2, 0, %v379_v24  ;;  %v800_v38 = vsel %vm785_vm3, %v798_v32, %v799_v33  ;;  %v597_v41 = vshll.u32 %v516_v35, 16  ;;  %v3205_v24 = vld [vmem:[%s3303_s23 + $0x40] sm:$0xff]  }
  0x24   : > { %949 = vrot.lane.b32.xlu1 %v794_v55, %s3235_s7  ;;  %723 = vrot.lane.b32.xlu0 %v552_v61, %s3232_s25  ;;  %v592_v34 = vshll.u32 %v3391_v28, 16  ;;  %v590_v39 = vshrl.u32 %v3391_v28, 16  ;;  %v383_v45 = vrot.slane %v381_v42, 7  ;;  %v801_v50 = vrot.slane %v3391_v28, 1 }
  0x25   : > { %v588_v29 = vsel %vm528_vm4, %v583_v26, %v587_v27  ;;  %v599_v44 = vrot.slane %v597_v41, 1  ;;  %v802_v51 = vrot.slane %v516_v35, 1  ;;  %v388_v53 = vshrl.u32 %v3203_v49, 16 }
  0x26   : > { %v594_v40 = vrot.slane %v592_v34, 1  ;;  %v386_v48 = vor.u32 %v384_v46, %v383_v45  ;;  %v517_v56 = vsel %vm3281_vm2, %v383_v45, 0  ;;  %v391_v58 = vshll.u32 %v3203_v49, 16 }
  0x27   : > { %v390_v57 = vrot.slane %v388_v53, 7  ;;  %v398_v21 = vshll.u32 %v3204_v9, 16  ;;  %v405_v36 = vshll.u32 %v3205_v24, 16  ;;  %vm2510_vm5 = vcmask 457728  }
  0x28   : > { %913 = vrot.lane.b32.xlu1 %v564_v63, %s3236_s8  ;;  %911 = vrot.lane.b32.xlu0 %v552_v61, %s3236_s8  ;;  %v595_v43 = vor.u32 %v594_v40, %v590_v39  ;;  %v3420_v52 = vsel %vm3281_vm2, 0, %v386_v48  ;;  %v609_v61 = vshll.u32 %v517_v56, 16 }
  0x29   : > { %v604_v54 = vshll.u32 %v3420_v52, 16  ;;  %v602_v59 = vshrl.u32 %v3420_v52, 16  ;;  %v393_v62 = vor.u32 %v391_v58, %v390_v57  ;;  %v804_v5 = vrot.slane %v3420_v52, 1 }
  0x2a   : > { %v600_v47 = vsel %vm528_vm4, %v595_v43, %v599_v44  ;;  %v611_v0 = vrot.slane %v609_v61, 1  ;;  %v518_v8 = vsel %vm3281_vm2, %v390_v57, 0 }
  0x2b   : > { %v606_v60 = vrot.slane %v604_v54, 1  ;;  %v3435_v1 = vsel %vm3281_vm2, 0, %v393_v62  ;;  %v621_v15 = vshll.u32 %v518_v8, 16  ;;  %v808_v26 = vrot.slane %v518_v8, 1 }
  0x2c   : > { %1013 = vrot.lane.b32.xlu1 %v576_v6, %s3237_s9  ;;  %1011 = vrot.lane.b32.xlu0 %v564_v63, %s3237_s9  ;;  %v616_v7 = vshll.u32 %v3435_v1, 16  ;;  %v614_v13 = vshrl.u32 %v3435_v1, 16  ;;  %v807_v25 = vrot.slane %v3435_v1, 1 }
  0x2d   : > { %v623_v19 = vrot.slane %v621_v15, 1 }
  0x2e   : > { %v618_v14 = vrot.slane %v616_v7, 1  ;;  %v809_v33 = vsel %vm785_vm3, %v807_v25, %v808_v26 }
  0x30   : > { %725 = vrot.lane.b32.xlu1 %v564_v63, %s3232_s25  ;;  %1043 = vrot.lane.b32.xlu0 %v794_v55, %s3238_s10  ;;  %v607_v63 = vor.u32 %v606_v60, %v602_v59  ;;  %v619_v17 = vor.u32 %v618_v14, %v614_v13 }
  0x32   : > { %v612_v4 = vsel %vm528_vm4, %v607_v63, %v611_v0  ;;  %v624_v22 = vsel %vm528_vm4, %v619_v17, %v623_v19 }
  0x34   : > { %727 = vrot.lane.b32.xlu1 %v576_v6, %s3232_s25  ;;  %1045 = vrot.lane.b32.xlu0 %v797_v16, %s3238_s10 }
  0x38   : > { %840 = vrot.lane.b32.xlu1 %v797_v16, %s3231_s24  ;;  %838 = vrot.lane.b32.xlu0 %v794_v55, %s3231_s24  ;;  %v803_v55 = vsel %vm785_vm3, %v801_v50, %v802_v51  ;;  %v3207_v50 = vld [vmem:[%s3303_s23 + $0x48] sm:$0xff]  }
  0x39   : > { %v412_v62 = vshll.u32 %v3207_v50, 16 }
  0x3c   : > { %873 = vrot.lane.b32.xlu1 %v3373_v12, %s3233_s26  ;;  %871 = vrot.lane.b32.xlu0 %v3335_v37, %s3233_s26 }
  0x40   : > { %917 = vrot.lane.b32.xlu1 %v588_v29, %s3236_s8  ;;  %915 = vrot.lane.b32.xlu0 %v576_v6, %s3236_s8  ;;  %v805_v6 = vrot.slane %v517_v56, 1  ;;  %v409_v56 = vshrl.u32 %v3207_v50, 16 }
  0x42   : > { %v806_v11 = vsel %vm785_vm3, %v804_v5, %v805_v6  ;;  %v411_v61 = vrot.slane %v409_v56, 7  ;;  %v3210_v5 = vld [vmem:[%s3303_s23 + $0x50] sm:$0xff]  }
  0x43   : > { %v416_v13 = vshrl.u32 %v3210_v5, 16 }
  0x44   : > { %953 = vrot.lane.b32.xlu1 %v800_v38, %s3235_s7  ;;  %951 = vrot.lane.b32.xlu0 %v797_v16, %s3235_s7  ;;  %v395_v16 = vshrl.u32 %v3204_v9, 16  ;;  %v521_v19 = vsel %vm3281_vm2, %v411_v61, 0 }
  0x45   : > { %v657_v25 = vshll.u32 %v521_v19, 16 }
  0x46   : > { %v397_v20 = vrot.slane %v395_v16, 7 }
  0x48   : > { %985 = vrot.lane.b32.xlu1 %v3391_v28, %s3234_s29  ;;  %983 = vrot.lane.b32.xlu0 %v3373_v12, %s3234_s29  ;;  %v400_v23 = vor.u32 %v398_v21, %v397_v20  ;;  %v519_v34 = vsel %vm3281_vm2, %v397_v20, 0  ;;  %v418_v20 = vrot.slane %v416_v13, 7  ;;  %v419_v21 = vshll.u32 %v3210_v5, 16 }
  0x49   : > { %v633_v40 = vshll.u32 %v519_v34, 16 }
  0x4a   : > { %v3464_v27 = vsel %vm3281_vm2, 0, %v400_v23 }
  0x4b   : > { %v628_v32 = vshll.u32 %v3464_v27, 16  ;;  %v635_v43 = vrot.slane %v633_v40, 1  ;;  %v810_v46 = vrot.slane %v3464_v27, 1 }
  0x4c   : > { %1017 = vrot.lane.b32.xlu1 %v600_v47, %s3237_s9  ;;  %1015 = vrot.lane.b32.xlu0 %v588_v29, %s3237_s9 }
  0x4d   : > { %v630_v39 = vrot.slane %v628_v32, 1 }
  0x50   : > { %729 = vrot.lane.b32.xlu1 %v588_v29, %s3232_s25  ;;  %1047 = vrot.lane.b32.xlu0 %v800_v38, %s3238_s10  ;;  %v402_v29 = vshrl.u32 %v3205_v24, 16 }
  0x52   : > { %v404_v35 = vrot.slane %v402_v29, 7  ;;  %v421_v29 = vor.u32 %v419_v21, %v418_v20 }
  0x54   : > { %731 = vrot.lane.b32.xlu1 %v600_v47, %s3232_s25  ;;  %1049 = vrot.lane.b32.xlu0 %v803_v55, %s3238_s10  ;;  %v407_v41 = vor.u32 %v405_v36, %v404_v35  ;;  %v520_v49 = vsel %vm3281_vm2, %v404_v35, 0 }
  0x55   : > { %v814_v9 = vrot.slane %v520_v49, 1 }
  0x56   : > { %v3479_v44 = vsel %vm3281_vm2, 0, %v407_v41  ;;  %v3539_v41 = vsel %vm3281_vm2, 0, %v421_v29 }
  0x57   : > { %v640_v48 = vshll.u32 %v3479_v44, 16  ;;  %v638_v53 = vshrl.u32 %v3479_v44, 16  ;;  %v813_v8 = vrot.slane %v3479_v44, 1  ;;  %v664_v50 = vshll.u32 %v3539_v41, 16 }
  0x58   : > { %844 = vrot.lane.b32.xlu1 %v803_v55, %s3231_s24  ;;  %842 = vrot.lane.b32.xlu0 %v800_v38, %s3231_s24  ;;  %v626_v38 = vshrl.u32 %v3464_v27, 16 }
  0x59   : > { %v642_v54 = vrot.slane %v640_v48, 1  ;;  %v3519_v17 = vsel %vm785_vm3, %v813_v8, %v814_v9 }
  0x5a   : > { %v631_v42 = vor.u32 %v630_v39, %v626_v38  ;;  %v659_v38 = vrot.slane %v657_v25, 1 }
  0x5b   : > { %v643_v59 = vor.u32 %v642_v54, %v638_v53  ;;  %v522_v54 = vsel %vm3281_vm2, %v418_v20, 0 }
  0x5c   : > { %877 = vrot.lane.b32.xlu1 %v3420_v52, %s3233_s26  ;;  %875 = vrot.lane.b32.xlu0 %v3391_v28, %s3233_s26  ;;  %v636_v45 = vsel %vm528_vm4, %v631_v42, %v635_v43  ;;  %v820_v29 = vrot.slane %v522_v54, 1 }
  0x60   : > { %921 = vrot.lane.b32.xlu1 %v612_v4, %s3236_s8  ;;  %919 = vrot.lane.b32.xlu0 %v600_v47, %s3236_s8  ;;  %v811_v47 = vrot.slane %v519_v34, 1 }
  0x62   : > { %v812_v51 = vsel %vm785_vm3, %v810_v46, %v811_v47  ;;  %v817_v47 = vrot.slane %v521_v19, 1 }
  0x64   : > { %957 = vrot.lane.b32.xlu1 %v806_v11, %s3235_s7  ;;  %955 = vrot.lane.b32.xlu0 %v803_v55, %s3235_s7  ;;  %v645_v55 = vshll.u32 %v520_v49, 16 }
  0x66   : > { %v647_v60 = vrot.slane %v645_v55, 1  ;;  %v3211_v55 = vld [vmem:[%s3303_s23 + $0x58] sm:$0xff]  }
  0x68   : > { %989 = vrot.lane.b32.xlu1 %v3435_v1, %s3234_s29  ;;  %987 = vrot.lane.b32.xlu0 %v3420_v52, %s3234_s29  ;;  %v3502_v63 = vsel %vm528_vm4, %v643_v59, %v647_v60  ;;  %v662_v60 = vshrl.u32 %v3539_v41, 16 }
  0x6c   : > { %1021 = vrot.lane.b32.xlu1 %v624_v22, %s3237_s9  ;;  %1019 = vrot.lane.b32.xlu0 %v612_v4, %s3237_s9 }
  0x70   : > { %733 = vrot.lane.b32.xlu1 %v612_v4, %s3232_s25  ;;  %1051 = vrot.lane.b32.xlu0 %v806_v11, %s3238_s10  ;;  %v414_v4 = vor.u32 %v412_v62, %v411_v61  ;;  %v666_v61 = vrot.slane %v664_v50, 1  ;;  %v669_v62 = vshll.u32 %v522_v54, 16 }
  0x72   : > { %v671_v13 = vrot.slane %v669_v62, 1 }
  0x74   : > { %735 = vrot.lane.b32.xlu1 %v624_v22, %s3232_s25  ;;  %1053 = vrot.lane.b32.xlu0 %v809_v33, %s3238_s10 }
  0x78   : > { %848 = vrot.lane.b32.xlu1 %v809_v33, %s3231_s24  ;;  %846 = vrot.lane.b32.xlu0 %v806_v11, %s3231_s24  ;;  %v3513_v11 = vsel %vm3281_vm2, 0, %v414_v4  ;;  %v423_v4 = vshrl.u32 %v3211_v55, 16 }
  0x79   : > { %v652_v15 = vshll.u32 %v3513_v11, 16  ;;  %v650_v23 = vshrl.u32 %v3513_v11, 16  ;;  %v816_v46 = vrot.slane %v3513_v11, 1 }
  0x7b   : > { %v654_v24 = vrot.slane %v652_v15, 1  ;;  %v425_v15 = vrot.slane %v423_v4, 7 }
  0x7c   : > { %881 = vrot.lane.b32.xlu1 %v3464_v27, %s3233_s26  ;;  %879 = vrot.lane.b32.xlu0 %v3435_v1, %s3233_s26 }
  0x7d   : > { %v655_v36 = vor.u32 %v654_v24, %v650_v23  ;;  %v3212_v23 = vld [vmem:[%s3303_s23 + $0x60] sm:$0xff]  }
  0x7e   : > { %v835_v57 = vpop.permute.xlu1 %834 }
  0x7f   : > { %v660_v49 = vsel %vm528_vm4, %v655_v36, %v659_v38 }
  0x80   : > { %925 = vrot.lane.b32.xlu1 %v636_v45, %s3236_s8  ;;  %923 = vrot.lane.b32.xlu0 %v624_v22, %s3236_s8 }
  0x82   : > { %v722_v58 = vpop.permute.xlu0 %721 }
  0x83   : > { %v1077_v32 = vsel %vm1075_vm6, %v3287_v3, %v722_v58  ;;  %v818_v58 = vsel %vm785_vm3, %v816_v46, %v817_v47 }
  0x84   : > { %961 = vrot.lane.b32.xlu1 %v812_v51, %s3235_s7  ;;  %959 = vrot.lane.b32.xlu0 %v809_v33, %s3235_s7  ;;  %v1110_v39 = vsel %vm1108_vm7, %v1077_v32, %v835_v57 }
  0x88   : > { %993 = vrot.lane.b32.xlu1 %v3479_v44, %s3234_s29  ;;  %991 = vrot.lane.b32.xlu0 %v3464_v27, %s3234_s29 }
  0x8a   : > { %v870_v0 = vpop.permute.xlu1 %869  ;;  %v868_v6 = vpop.permute.xlu0 %867 }
  0x8c   : > { %1025 = vrot.lane.b32.xlu1 %v3502_v63, %s3237_s9  ;;  %1023 = vrot.lane.b32.xlu0 %v636_v45, %s3237_s9 }
  0x8e   : > { %v3508_v7 = vpop.permute.xlu1 %981  ;;  %v980_v14 = vpop.permute.xlu0 %979 }
  0x90   : > { %737 = vrot.lane.b32.xlu1 %v636_v45, %s3232_s25  ;;  %1055 = vrot.lane.b32.xlu0 %v812_v51, %s3238_s10 }
  0x92   : > { %v837_v16 = vpop.permute.xlu1 %836  ;;  %v948_v22 = vpop.permute.xlu0 %947 }
  0x94   : > { %739 = vrot.lane.b32.xlu1 %v3502_v63, %s3232_s25  ;;  %1057 = vrot.lane.b32.xlu0 %v3519_v17, %s3238_s10 }
  0x96   : > { %v950_v26 = vpop.permute.xlu1 %949  ;;  %v724_v33 = vpop.permute.xlu0 %723 }
  0x97   : > { %v1079_v34 = vsel %vm1075_vm6, %v3325_v31, %v724_v33  ;;  %v1143_v31 = vsel %vm1141_vm8, %v1110_v39, %v868_v6  ;;  %v430_v33 = vshrl.u32 %v3212_v23, 16  ;;  %v523_v39 = vsel %vm3281_vm2, %v425_v15, 0 }
  0x98   : > { %852 = vrot.lane.b32.xlu1 %v3519_v17, %s3231_s24  ;;  %v1112_v35 = vsel %vm1108_vm7, %v1079_v34, %v837_v16  ;;  %850 = vrot.lane.b32.xlu0 %v812_v51, %s3231_s24  ;;  %v426_v16 = vshll.u32 %v3211_v55, 16  ;;  %v681_v46 = vshll.u32 %v523_v39, 16 }
  0x99   : > { %v1145_v42 = vsel %vm1141_vm8, %v1112_v35, %v870_v0 }
  0x9a   : > { %v914_v40 = vpop.permute.xlu1 %913  ;;  %v912_v43 = vpop.permute.xlu0 %911 }
  0x9b   : > { %v1176_v45 = vsel %vm1174_vm9, %v1143_v31, %v912_v43  ;;  %v1178_v51 = vsel %vm1174_vm9, %v1145_v42, %v914_v40  ;;  %v432_v40 = vrot.slane %v430_v33, 7  ;;  %v433_v31 = vshll.u32 %v3212_v23, 16 }
  0x9c   : > { %885 = vrot.lane.b32.xlu1 %v3513_v11, %s3233_s26  ;;  %v1209_v48 = vsel %vm1207_vm10, %v1176_v45, %v948_v22  ;;  %883 = vrot.lane.b32.xlu0 %v3479_v44, %s3233_s26  ;;  %v1211_v59 = vsel %vm1207_vm10, %v1178_v51, %v950_v26  ;;  %v428_v22 = vor.u32 %v426_v16, %v425_v15  ;;  %v819_v26 = vrot.slane %v3539_v41, 1 }
  0x9d   : > { %v1242_v57 = vsel %vm1240_vm11, %v1209_v48, %v980_v14  ;;  %v1244_v8 = vsel %vm1240_vm11, %v1211_v59, %v3508_v7  ;;  %v435_v48 = vor.u32 %v433_v31, %v432_v40  ;;  %v683_v51 = vrot.slane %v681_v46, 1 }
  0x9e   : > { %v1014_v53 = vpop.permute.xlu1 %1013  ;;  %v1012_v56 = vpop.permute.xlu0 %1011  ;;  %v3585_v32 = vsel %vm3281_vm2, 0, %v428_v22  ;;  %v821_v38 = vsel %vm785_vm3, %v819_v26, %v820_v29  ;;  %v524_v4 = vsel %vm3281_vm2, %v432_v40, 0 }
  0x9f   : > { %v1275_v5 = vsel %vm1273_vm12, %v1242_v57, %v1012_v56  ;;  %v1277_v19 = vsel %vm1273_vm12, %v1244_v8, %v1014_v53  ;;  %v676_v35 = vshll.u32 %v3585_v32, 16  ;;  %v674_v43 = vshrl.u32 %v3585_v32, 16 }
  0xa0   : > { %929 = vrot.lane.b32.xlu1 %v660_v49, %s3236_s8  ;;  %927 = vrot.lane.b32.xlu0 %v3502_v63, %s3236_s8  ;;  %v667_v63 = vor.u32 %v666_v61, %v662_v60  ;;  %v3600_v54 = vsel %vm3281_vm2, 0, %v435_v48  ;;  %v822_v56 = vrot.slane %v3585_v32, 1  ;;  %v823_v57 = vrot.slane %v523_v39, 1 }
  0xa1   : > { %v678_v45 = vrot.slane %v676_v35, 1  ;;  %v688_v60 = vshll.u32 %v3600_v54, 16  ;;  %v693_v16 = vshll.u32 %v524_v4, 16  ;;  %v826_v48 = vrot.slane %v524_v4, 1 }
  0xa2   : > { %v726_v0 = vpop.permute.xlu1 %725  ;;  %v1044_v6 = vpop.permute.xlu0 %1043 }
  0xa3   : > { %v1308_v9 = vsel %vm1306_vm13, %v1275_v5, %v1044_v6  ;;  %v679_v50 = vor.u32 %v678_v45, %v674_v43  ;;  %v1081_v59 = vsel %vm1075_vm6, %v3319_v30, %v726_v0  ;;  %v3213_v5 = vld [vmem:[%s3303_s23 + $0x68] sm:$0xff]   ;;  %v690_v15 = vrot.slane %v688_v60, 1  ;;  %v3214_v43 = vld [vmem:[%s3303_s23 + $0x70] sm:$0xff]  }
  0xa4   : > { %965 = vrot.lane.b32.xlu1 %v818_v58, %s3235_s7  ;;  %963 = vrot.lane.b32.xlu0 %v3519_v17, %s3235_s7  ;;  %v672_v17 = vsel %vm528_vm4, %v667_v63, %v671_v13  ;;  %v686_v13 = vshrl.u32 %v3600_v54, 16  ;;  %v695_v29 = vrot.slane %v693_v16, 1  ;;  %v440_v35 = vshll.u32 %v3213_v5, 16 }
  0xa5   : > { %3100 = vmatprep.mubr.msk.bf16.mxu0 %vm1366_vm14, %v1308_v9  ;;  %v824_v9 = vsel %vm785_vm3, %v822_v56, %v823_v57  ;;  %v447_v60 = vshll.u32 %v3214_v43, 16 }
  0xa6   : > { %v728_v14 = vpop.permute.xlu1 %727  ;;  %v1046_v20 = vpop.permute.xlu0 %1045 }
  0xa7   : > { %v1310_v7 = vsel %vm1306_vm13, %v1277_v19, %v1046_v20  ;;  %v1083_v6 = vsel %vm1075_vm6, %v3335_v37, %v728_v14  ;;  %v437_v20 = vshrl.u32 %v3213_v5, 16 }
  0xa8   : > { %997 = vrot.lane.b32.xlu1 %v3539_v41, %s3234_s29  ;;  %995 = vrot.lane.b32.xlu0 %v3513_v11, %s3234_s29 }
  0xa9   : > { %3101 = vmatmul.mubr.msk.bf16.vlgmr.msra.gmra.mrb[0].mxu0 %vm1366_vm14, %v1310_v7 }
  0xaa   : > { %v841_v21 = vpop.permute.xlu1 %840  ;;  %v839_v24 = vpop.permute.xlu0 %838 }
  0xab   : > { %v1114_v61 = vsel %vm1108_vm7, %v1081_v59, %v839_v24  ;;  %v1116_v19 = vsel %vm1108_vm7, %v1083_v6, %v841_v21  ;;  %v691_v21 = vor.u32 %v690_v15, %v686_v13 }
  0xac   : > { %1029 = vrot.lane.b32.xlu1 %v672_v17, %s3237_s9  ;;  %1027 = vrot.lane.b32.xlu0 %v660_v49, %s3237_s9 }
  0xae   : > { %v874_v25 = vpop.permute.xlu1 %873  ;;  %v872_v34 = vpop.permute.xlu0 %871 }
  0xaf   : > { %v1147_v8 = vsel %vm1141_vm8, %v1114_v61, %v872_v34  ;;  %v1149_v7 = vsel %vm1141_vm8, %v1116_v19, %v874_v25  ;;  %v439_v34 = vrot.slane %v437_v20, 7 }
  0xb0   : > { %741 = vrot.lane.b32.xlu1 %v660_v49, %s3232_s25  ;;  %1059 = vrot.lane.b32.xlu0 %v818_v58, %s3238_s10 }
  0xb1   : > { %v525_v57 = vsel %vm3281_vm2, %v439_v34, 0 }
  0xb2   : > { %v918_v36 = vpop.permute.xlu1 %917  ;;  %v916_v42 = vpop.permute.xlu0 %915  ;;  %v705_v4 = vshll.u32 %v525_v57, 16  ;;  %v829_v19 = vrot.slane %v525_v57, 1 }
  0xb3   : > { %v1180_v0 = vsel %vm1174_vm9, %v1147_v8, %v916_v42  ;;  %v1182_v24 = vsel %vm1174_vm9, %v1149_v7, %v918_v36  ;;  %v442_v42 = vor.u32 %v440_v35, %v439_v34 }
  0xb4   : > { %743 = vrot.lane.b32.xlu1 %v672_v17, %s3232_s25  ;;  %1061 = vrot.lane.b32.xlu0 %v821_v38, %s3238_s10 }
  0xb6   : > { %v954_v47 = vpop.permute.xlu1 %953  ;;  %v952_v49 = vpop.permute.xlu0 %951 }
  0xb7   : > { %v1213_v63 = vsel %vm1207_vm10, %v1180_v0, %v952_v49  ;;  %v1215_v26 = vsel %vm1207_vm10, %v1182_v24, %v954_v47  ;;  %v825_v47 = vrot.slane %v3600_v54, 1  ;;  %v3651_v49 = vsel %vm3281_vm2, 0, %v442_v42  ;;  %v3215_v24 = vld [vmem:[%s3303_s23 + $0x78] sm:$0xff]  }
  0xb8   : > { %856 = vrot.lane.b32.xlu1 %v821_v38, %s3231_s24  ;;  %854 = vrot.lane.b32.xlu0 %v818_v58, %s3231_s24  ;;  %v684_v58 = vsel %vm528_vm4, %v679_v50, %v683_v51  ;;  %v444_v50 = vshrl.u32 %v3214_v43, 16  ;;  %v707_v0 = vrot.slane %v705_v4, 1  ;;  %v828_v16 = vrot.slane %v3651_v49, 1 }
  0xb9   : > { %v827_v56 = vsel %vm785_vm3, %v825_v47, %v826_v48 }
  0xba   : > { %v986_v53 = vpop.permute.xlu1 %985  ;;  %v984_v55 = vpop.permute.xlu0 %983  ;;  %v446_v59 = vrot.slane %v444_v50, 7 }
  0xbb   : > { %v1246_v37 = vsel %vm1240_vm11, %v1213_v63, %v984_v55  ;;  %v1248_v25 = vsel %vm1240_vm11, %v1215_v26, %v986_v53  ;;  %v700_v53 = vshll.u32 %v3651_v49, 16 }
  0xbc   : > { %889 = vrot.lane.b32.xlu1 %v3585_v32, %s3233_s26  ;;  %887 = vrot.lane.b32.xlu0 %v3539_v41, %s3233_s26  ;;  %v449_v6 = vor.u32 %v447_v60, %v446_v59 }
  0xbe   : > { %v1018_v62 = vpop.permute.xlu1 %1017  ;;  %v1016_v30 = vpop.permute.xlu0 %1015  ;;  %v3666_v13 = vsel %vm3281_vm2, 0, %v449_v6 }
  0xbf   : > { %v1279_v22 = vsel %vm1273_vm12, %v1246_v37, %v1016_v30  ;;  %v1281_v36 = vsel %vm1273_vm12, %v1248_v25, %v1018_v62  ;;  %v698_v62 = vshrl.u32 %v3651_v49, 16  ;;  %v712_v20 = vshll.u32 %v3666_v13, 16 }
  0xc0   : > { %933 = vrot.lane.b32.xlu1 %v684_v58, %s3236_s8  ;;  %931 = vrot.lane.b32.xlu0 %v672_v17, %s3236_s8  ;;  %v710_v25 = vshrl.u32 %v3666_v13, 16  ;;  %v831_v4 = vrot.slane %v3666_v13, 1 }
  0xc1   : > { %v714_v34 = vrot.slane %v712_v20, 1 }
  0xc2   : > { %v3626_v14 = vpop.permute.xlu1 %729  ;;  %v1048_v23 = vpop.permute.xlu0 %1047 }
  0xc3   : > { %v1312_v17 = vsel %vm1306_vm13, %v1279_v22, %v1048_v23  ;;  %v1085_v37 = vsel %vm1075_vm6, %v3373_v12, %v3626_v14  ;;  %v526_v23 = vsel %vm3281_vm2, %v446_v59, 0 }
  0xc4   : > { %969 = vrot.lane.b32.xlu1 %v824_v9, %s3235_s7  ;;  %967 = vrot.lane.b32.xlu0 %v821_v38, %s3235_s7  ;;  %v696_v38 = vsel %vm528_vm4, %v691_v21, %v695_v29  ;;  %v830_v21 = vsel %vm785_vm3, %v828_v16, %v829_v19  ;;  %v717_v35 = vshll.u32 %v526_v23, 16 }
  0xc5   : > { %3104 = vmatprep.mubr.msk.bf16.mxu0 %vm1366_vm14, %v1312_v17 }
  0xc6   : > { %v732_v33 = vpop.permute.xlu1 %731  ;;  %v1050_v39 = vpop.permute.xlu0 %1049  ;;  %v719_v48 = vrot.slane %v717_v35, 1 }
  0xc7   : > { %v1314_v40 = vsel %vm1306_vm13, %v1281_v36, %v1050_v39  ;;  %v1087_v17 = vsel %vm1075_vm6, %v3391_v28, %v732_v33  ;;  %v451_v39 = vshrl.u32 %v3215_v24, 16 }
  0xc8   : > { %1001 = vrot.lane.b32.xlu1 %v3600_v54, %s3234_s29  ;;  %999 = vrot.lane.b32.xlu0 %v3585_v32, %s3234_s29 }
  0xc9   : > { %3105 = vmatmul.mubr.msk.bf16.gmra.mrb[4].mxu0 %vm1366_vm14, %v1314_v40 }
  0xca   : > { %v845_v31 = vpop.permute.xlu1 %844  ;;  %v843_v45 = vpop.permute.xlu0 %842 }
  0xcb   : > { %v1118_v7 = vsel %vm1108_vm7, %v1085_v37, %v843_v45  ;;  %v1120_v36 = vsel %vm1108_vm7, %v1087_v17, %v845_v31  ;;  %v715_v31 = vor.u32 %v714_v34, %v710_v25 }
  0xcc   : > { %1033 = vrot.lane.b32.xlu1 %v696_v38, %s3237_s9  ;;  %1031 = vrot.lane.b32.xlu0 %v684_v58, %s3237_s9 }
  0xce   : > { %v878_v46 = vpop.permute.xlu1 %877  ;;  %v876_v51 = vpop.permute.xlu0 %875 }
  0xcf   : > { %v1151_v26 = vsel %vm1141_vm8, %v1118_v7, %v876_v51  ;;  %v1153_v40 = vsel %vm1141_vm8, %v1120_v36, %v878_v46  ;;  %v453_v51 = vrot.slane %v451_v39, 7 }
  0xd0   : > { %745 = vrot.lane.b32.xlu1 %v684_v58, %s3232_s25  ;;  %1063 = vrot.lane.b32.xlu0 %v824_v9, %s3238_s10  ;;  %v702_v58 = vrot.slane %v700_v53, 1  ;;  %v454_v53 = vshll.u32 %v3215_v24, 16 }
  0xd2   : > { %v922_v55 = vpop.permute.xlu1 %921  ;;  %v920_v61 = vpop.permute.xlu0 %919  ;;  %v703_v30 = vor.u32 %v702_v58, %v698_v62 }
  0xd3   : > { %v1184_v14 = vsel %vm1174_vm9, %v1151_v26, %v920_v61  ;;  %v1186_v45 = vsel %vm1174_vm9, %v1153_v40, %v922_v55  ;;  %v456_v61 = vor.u32 %v454_v53, %v453_v51 }
  0xd4   : > { %747 = vrot.lane.b32.xlu1 %v696_v38, %s3232_s25  ;;  %1065 = vrot.lane.b32.xlu0 %v827_v56, %s3238_s10 }
  0xd5   : > { %v510_v6 = vsel %vm3281_vm2, 0, %v456_v61 }
  0xd6   : > { %v958_v5 = vpop.permute.xlu1 %957  ;;  %v956_v8 = vpop.permute.xlu0 %955  ;;  %v900_v19 = vshrl.u32 %v510_v6, 16 }
  0xd7   : > { %v1217_v29 = vsel %vm1207_vm10, %v1184_v14, %v956_v8  ;;  %v944_v14 = vrot.slane %v510_v6, 1 }
  0xd8   : > { %860 = vrot.lane.b32.xlu1 %v827_v56, %s3231_s24  ;;  %858 = vrot.lane.b32.xlu0 %v824_v9, %s3231_s24  ;;  %v708_v9 = vsel %vm528_vm4, %v703_v30, %v707_v0  ;;  %v902_v30 = vshll.u32 %v510_v6, 16 }
  0xda   : > { %v990_v63 = vpop.permute.xlu1 %989  ;;  %v988_v15 = vpop.permute.xlu0 %987  ;;  %v904_v37 = vrot.slane %v902_v30, 1 }
  0xdb   : > { %v1250_v28 = vsel %vm1240_vm11, %v1217_v29, %v988_v15  ;;  %v527_v15 = vsel %vm3281_vm2, %v453_v51, 0 }
  0xdc   : > { %893 = vrot.lane.b32.xlu1 %v3651_v49, %s3233_s26  ;;  %891 = vrot.lane.b32.xlu0 %v3600_v54, %s3233_s26  ;;  %v907_v20 = vshll.u32 %v527_v15, 16  ;;  %v945_v29 = vrot.slane %v527_v15, 1 }
  0xde   : > { %v1022_v22 = vpop.permute.xlu1 %1021  ;;  %v1020_v12 = vpop.permute.xlu0 %1019 }
  0xdf   : > { %v1283_v42 = vsel %vm1273_vm12, %v1250_v28, %v1020_v12 }
  0xe0   : > { %937 = vrot.lane.b32.xlu1 %v708_v9, %s3236_s8  ;;  %935 = vrot.lane.b32.xlu0 %v696_v38, %s3236_s8  ;;  %v1219_v38 = vsel %vm1207_vm10, %v1186_v45, %v958_v5  ;;  %v832_v5 = vrot.slane %v526_v23, 1  ;;  %v909_v23 = vrot.slane %v907_v20, 1 }
  0xe1   : > { %v1252_v50 = vsel %vm1240_vm11, %v1219_v38, %v990_v63 }
  0xe2   : > { %v734_v33 = vpop.permute.xlu1 %733  ;;  %v1052_v43 = vpop.permute.xlu0 %1051  ;;  %v1285_v57 = vsel %vm1273_vm12, %v1252_v50, %v1022_v22  ;;  %v833_v63 = vsel %vm785_vm3, %v831_v4, %v832_v5 }
  0xe3   : > { %v1316_v47 = vsel %vm1306_vm13, %v1283_v42, %v1052_v43  ;;  %v1089_v26 = vsel %vm1075_vm6, %v3420_v52, %v734_v33  ;;  %v946_v33 = vsel %vm785_vm3, %v944_v14, %v945_v29 }
  0xe4   : > { %973 = vrot.lane.b32.xlu1 %v830_v21, %s3235_s7  ;;  %971 = vrot.lane.b32.xlu0 %v827_v56, %s3235_s7  ;;  %v720_v56 = vsel %vm528_vm4, %v715_v31, %v719_v48 }
  0xe5   : > { %3108 = vmatprep.mubr.msk.bf16.mxu0 %vm1366_vm14, %v1316_v47 }
  0xe6   : > { %v736_v46 = vpop.permute.xlu1 %735  ;;  %v1054_v55 = vpop.permute.xlu0 %1053 }
  0xe7   : > { %v1318_v59 = vsel %vm1306_vm13, %v1285_v57, %v1054_v55 }
  0xe8   : > { %1005 = vrot.lane.b32.xlu1 %v3666_v13, %s3234_s29  ;;  %1003 = vrot.lane.b32.xlu0 %v3651_v49, %s3234_s29 }
  0xe9   : > { %3109 = vmatmul.mubr.msk.bf16.gmra.mrb[8].mxu0 %vm1366_vm14, %v1318_v59 }
  0xea   : > { %v849_v60 = vpop.permute.xlu1 %848  ;;  %v847_v62 = vpop.permute.xlu0 %846 }
  0xeb   : > { %v1122_v25 = vsel %vm1108_vm7, %v1089_v26, %v847_v62 }
  0xec   : > { %1037 = vrot.lane.b32.xlu1 %v720_v56, %s3237_s9  ;;  %1035 = vrot.lane.b32.xlu0 %v708_v9, %s3237_s9 }
  0xee   : > { %v882_v58 = vpop.permute.xlu1 %881  ;;  %v880_v8 = vpop.permute.xlu0 %879 }
  0xef   : > { %v1155_v35 = vsel %vm1141_vm8, %v1122_v25, %v880_v8 }
  0xf0   : > { %749 = vrot.lane.b32.xlu1 %v708_v9, %s3232_s25  ;;  %1067 = vrot.lane.b32.xlu0 %v830_v21, %s3238_s10  ;;  %v905_v9 = vor.u32 %v904_v37, %v900_v19 }
  0xf2   : > { %v926_v0 = vpop.permute.xlu1 %925  ;;  %v924_v16 = vpop.permute.xlu0 %923  ;;  %v910_v12 = vsel %vm528_vm4, %v905_v9, %v909_v23 }
  0xf3   : > { %v1188_v28 = vsel %vm1174_vm9, %v1155_v35, %v924_v16 }
  0xf4   : > { %751 = vrot.lane.b32.xlu1 %v720_v56, %s3232_s25  ;;  %1069 = vrot.lane.b32.xlu0 %v833_v63, %s3238_s10 }
  0xf6   : > { %v962_v7 = vpop.permute.xlu1 %961  ;;  %v960_v22 = vpop.permute.xlu0 %959 }
  0xf7   : > { %v1221_v52 = vsel %vm1207_vm10, %v1188_v28, %v960_v22 }
  0xf8   : > { %864 = vrot.lane.b32.xlu1 %v833_v63, %s3231_s24  ;;  %862 = vrot.lane.b32.xlu0 %v830_v21, %s3231_s24  ;;  %v1091_v21 = vsel %vm1075_vm6, %v3435_v1, %v736_v46 }
  0xf9   : > { %v1124_v39 = vsel %vm1108_vm7, %v1091_v21, %v849_v60 }
  0xfa   : > { %v994_v24 = vpop.permute.xlu1 %993  ;;  %v992_v17 = vpop.permute.xlu0 %991  ;;  %v1157_v1 = vsel %vm1141_vm8, %v1124_v39, %v882_v58 }
  0xfb   : > { %v1254_v40 = vsel %vm1240_vm11, %v1221_v52, %v992_v17  ;;  %v1190_v47 = vsel %vm1174_vm9, %v1157_v1, %v926_v0 }
  0xfc   : > { %897 = vrot.lane.b32.xlu1 %v510_v6, %s3233_s26  ;;  %895 = vrot.lane.b32.xlu0 %v3666_v13, %s3233_s26  ;;  %v1223_v31 = vsel %vm1207_vm10, %v1190_v47, %v962_v7 }
  0xfd   : > { %v1256_v48 = vsel %vm1240_vm11, %v1223_v31, %v994_v24 }
  0xfe   : > { %v1026_v34 = vpop.permute.xlu1 %1025  ;;  %v1024_v36 = vpop.permute.xlu0 %1023 }
  0xff   : > { %v1287_v43 = vsel %vm1273_vm12, %v1254_v40, %v1024_v36  ;;  %v1289_v46 = vsel %vm1273_vm12, %v1256_v48, %v1026_v34 }
 0x100   : > { %941 = vrot.lane.b32.xlu1 %v910_v12, %s3236_s8  ;;  %939 = vrot.lane.b32.xlu0 %v720_v56, %s3236_s8 }
 0x102   : > { %v738_v42 = vpop.permute.xlu1 %737  ;;  %v1056_v45 = vpop.permute.xlu0 %1055 }
 0x103   : > { %v1320_v38 = vsel %vm1306_vm13, %v1287_v43, %v1056_v45 }
 0x104   : > { %977 = vrot.lane.b32.xlu1 %v946_v33, %s3235_s7  ;;  %975 = vrot.lane.b32.xlu0 %v833_v63, %s3235_s7 }
 0x105   : > { %3112 = vmatprep.mubr.msk.bf16.mxu0 %vm1366_vm14, %v1320_v38 }
 0x106   : > { %v740_v50 = vpop.permute.xlu1 %739  ;;  %v1058_v51 = vpop.permute.xlu0 %1057 }
 0x107   : > { %v1322_v53 = vsel %vm1306_vm13, %v1289_v46, %v1058_v51  ;;  %v1095_v0 = vsel %vm1075_vm6, %v3479_v44, %v740_v50 }
 0x108   : > { %1009 = vrot.lane.b32.xlu1 %v3287_v3, %s3234_s29  ;;  %1007 = vrot.lane.b32.xlu0 %v510_v6, %s3234_s29  ;;  %v1093_v6 = vsel %vm1075_vm6, %v3464_v27, %v738_v42 }
 0x109   : > { %3113 = vmatmul.mubr.msk.bf16.gmra.mrb[12].mxu0 %vm1366_vm14, %v1322_v53 }
 0x10a   : > { %v853_v57 = vpop.permute.xlu1 %852  ;;  %v851_v55 = vpop.permute.xlu0 %850 }
 0x10b   : > { %v1126_v8 = vsel %vm1108_vm7, %v1093_v6, %v851_v55  ;;  %v1128_v37 = vsel %vm1108_vm7, %v1095_v0, %v853_v57 }
 0x10c   : > { %1041 = vrot.lane.b32.xlu1 %v3310_v18, %s3237_s9  ;;  %1039 = vrot.lane.b32.xlu0 %v910_v12, %s3237_s9 }
 0x10e   : > { %v886_v59 = vpop.permute.xlu1 %885  ;;  %v884_v56 = vpop.permute.xlu0 %883 }
 0x10f   : > { %v1159_v63 = vsel %vm1141_vm8, %v1126_v8, %v884_v56  ;;  %v1161_v27 = vsel %vm1141_vm8, %v1128_v37, %v886_v59 }
 0x110   : > { %1073 = vrot.lane.b32.xlu1 %v3298_v10, %s3238_s10  ;;  %1071 = vrot.lane.b32.xlu0 %v946_v33, %s3238_s10 }
 0x112   : > { %v930_v60 = vpop.permute.xlu1 %929  ;;  %v928_v61 = vpop.permute.xlu0 %927 }
 0x113   : > { %v1192_v16 = vsel %vm1174_vm9, %v1159_v63, %v928_v61  ;;  %v1194_v23 = vsel %vm1174_vm9, %v1161_v27, %v930_v60 }
 0x114   : > { %1968 = vrot.lane.b32.xlu0 %v3310_v18, %s3231_s24 }
 0x116   : > { %v966_v62 = vpop.permute.xlu1 %965  ;;  %v964_v58 = vpop.permute.xlu0 %963 }
 0x117   : > { %v1225_v19 = vsel %vm1207_vm10, %v1192_v16, %v964_v58  ;;  %v1227_v24 = vsel %vm1207_vm10, %v1194_v23, %v966_v62 }
 0x118   : > { %2075 = vrot.lane.b32.xlu0 %v3298_v10, %s3236_s8 }
 0x11a   : > { %v998_v4 = vpop.permute.xlu1 %997  ;;  %v996_v5 = vpop.permute.xlu0 %995 }
 0x11b   : > { %v1258_v20 = vsel %vm1240_vm11, %v1225_v19, %v996_v5  ;;  %v1260_v17 = vsel %vm1240_vm11, %v1227_v24, %v998_v4 }
 0x11e   : > { %v1030_v30 = vpop.permute.xlu1 %1029  ;;  %v1028_v15 = vpop.permute.xlu0 %1027 }
 0x11f   : > { %v1291_v22 = vsel %vm1273_vm12, %v1258_v20, %v1028_v15  ;;  %v1293_v12 = vsel %vm1273_vm12, %v1260_v17, %v1030_v30 }
 0x122   : > { %v742_v7 = vpop.permute.xlu1 %741  ;;  %v1060_v9 = vpop.permute.xlu0 %1059 }
 0x123   : > { %v1324_v44 = vsel %vm1306_vm13, %v1291_v22, %v1060_v9  ;;  %v1097_v42 = vsel %vm1075_vm6, %v3513_v11, %v742_v7 }
 0x124   : > { %3116 = vmatprep.mubr.msk.bf16.mxu0 %vm1366_vm14, %v1324_v44 }
 0x126   : > { %v744_v26 = vpop.permute.xlu1 %743  ;;  %v1062_v14 = vpop.permute.xlu0 %1061 }
 0x127   : > { %v1326_v29 = vsel %vm1306_vm13, %v1293_v12, %v1062_v14  ;;  %v1099_v45 = vsel %vm1075_vm6, %v3539_v41, %v744_v26 }
 0x128   : > { %3117 = vmatmul.mubr.msk.bf16.gmra.mrb[16].mxu0 %vm1366_vm14, %v1326_v29 }
 0x12a   : > { %v857_v25 = vpop.permute.xlu1 %856  ;;  %v855_v34 = vpop.permute.xlu0 %854 }
 0x12b   : > { %v1130_v1 = vsel %vm1108_vm7, %v1097_v42, %v855_v34  ;;  %v1132_v50 = vsel %vm1108_vm7, %v1099_v45, %v857_v25 }
 0x12e   : > { %v890_v21 = vpop.permute.xlu1 %889  ;;  %v888_v35 = vpop.permute.xlu0 %887 }
 0x12f   : > { %v1163_v47 = vsel %vm1141_vm8, %v1130_v1, %v888_v35  ;;  %v1165_v11 = vsel %vm1141_vm8, %v1132_v50, %v890_v21 }
 0x132   : > { %v934_v36 = vpop.permute.xlu1 %933  ;;  %v932_v28 = vpop.permute.xlu0 %931 }
 0x133   : > { %v1196_v31 = vsel %vm1174_vm9, %v1163_v47, %v932_v28  ;;  %v1198_v55 = vsel %vm1174_vm9, %v1165_v11, %v934_v36 }
 0x136   : > { %v970_v52 = vpop.permute.xlu1 %969  ;;  %v968_v33 = vpop.permute.xlu0 %967 }
 0x137   : > { %v1229_v48 = vsel %vm1207_vm10, %v1196_v31, %v968_v33  ;;  %v1231_v59 = vsel %vm1207_vm10, %v1198_v55, %v970_v52  ;;  %v3831_v31 = vld [vmem:[%s4570_s2] ss:$0 sm:$0xff] }
 0x13a   : > { %v1002_v39 = vpop.permute.xlu1 %1001  ;;  %v1000_v40 = vpop.permute.xlu0 %999 }
 0x13b   : > { %v1262_v46 = vsel %vm1240_vm11, %v1229_v48, %v1000_v40  ;;  %v1264_v56 = vsel %vm1240_vm11, %v1231_v59, %v1002_v39 }
 0x13e   : > { %v1034_v43 = vpop.permute.xlu1 %1033  ;;  %v1032_v38 = vpop.permute.xlu0 %1031 }
 0x13f   : > { %v1295_v53 = vsel %vm1273_vm12, %v1262_v46, %v1032_v38  ;;  %v1297_v61 = vsel %vm1273_vm12, %v1264_v56, %v1034_v43 }
 0x142   : > { %v746_v51 = vpop.permute.xlu1 %745  ;;  %v1064_v57 = vpop.permute.xlu0 %1063 }
 0x143   : > { %v1328_v41 = vsel %vm1306_vm13, %v1295_v53, %v1064_v57  ;;  %v1101_v37 = vsel %vm1075_vm6, %v3585_v32, %v746_v51 }
 0x144   : > { %3120 = vmatprep.mubr.msk.bf16.mxu0 %vm1366_vm14, %v1328_v41 }
 0x146   : > { %v748_v60 = vpop.permute.xlu1 %747  ;;  %v1066_v62 = vpop.permute.xlu0 %1065 }
 0x147   : > { %v1330_v58 = vsel %vm1306_vm13, %v1297_v61, %v1066_v62  ;;  %v1103_v27 = vsel %vm1075_vm6, %v3600_v54, %v748_v60 }
 0x148   : > { %3121 = vmatmul.mubr.msk.bf16.gmra.mrb[20].mxu0 %vm1366_vm14, %v1330_v58 }
 0x14a   : > { %v861_v4 = vpop.permute.xlu1 %860  ;;  %v859_v5 = vpop.permute.xlu0 %858 }
 0x14b   : > { %v1134_v20 = vsel %vm1108_vm7, %v1101_v37, %v859_v5  ;;  %v1136_v24 = vsel %vm1108_vm7, %v1103_v27, %v861_v4 }
 0x14e   : > { %v894_v6 = vpop.permute.xlu1 %893  ;;  %v892_v8 = vpop.permute.xlu0 %891 }
 0x14f   : > { %v1167_v22 = vsel %vm1141_vm8, %v1134_v20, %v892_v8  ;;  %v1169_v32 = vsel %vm1141_vm8, %v1136_v24, %v894_v6 }
 0x152   : > { %v938_v30 = vpop.permute.xlu1 %937  ;;  %v936_v0 = vpop.permute.xlu0 %935 }
 0x153   : > { %v1200_v23 = vsel %vm1174_vm9, %v1167_v22, %v936_v0  ;;  %v1202_v29 = vsel %vm1174_vm9, %v1169_v32, %v938_v30 }
 0x156   : > { %v974_v63 = vpop.permute.xlu1 %973  ;;  %v972_v15 = vpop.permute.xlu0 %971 }
 0x157   : > { %v1233_v44 = vsel %vm1207_vm10, %v1200_v23, %v972_v15  ;;  %v1235_v25 = vsel %vm1207_vm10, %v1202_v29, %v974_v63 }
 0x15a   : > { %v1006_v16 = vpop.permute.xlu1 %1005  ;;  %v1004_v19 = vpop.permute.xlu0 %1003 }
 0x15b   : > { %v1266_v17 = vsel %vm1240_vm11, %v1233_v44, %v1004_v19  ;;  %v1268_v34 = vsel %vm1240_vm11, %v1235_v25, %v1006_v16 }
 0x15e   : > { %v1038_v7 = vpop.permute.xlu1 %1037  ;;  %v1036_v9 = vpop.permute.xlu0 %1035 }
 0x15f   : > { %v1299_v12 = vsel %vm1273_vm12, %v1266_v17, %v1036_v9  ;;  %v1301_v35 = vsel %vm1273_vm12, %v1268_v34, %v1038_v7 }
 0x162   : > { %v750_v26 = vpop.permute.xlu1 %749  ;;  %v1068_v14 = vpop.permute.xlu0 %1067 }
 0x163   : > { %v1332_v54 = vsel %vm1306_vm13, %v1299_v12, %v1068_v14  ;;  %v1105_v46 = vsel %vm1075_vm6, %v3651_v49, %v750_v26 }
 0x164   : > { %3124 = vmatprep.mubr.msk.bf16.mxu0 %vm1366_vm14, %v1332_v54 }
 0x166   : > { %v752_v21 = vpop.permute.xlu1 %751  ;;  %v1070_v36 = vpop.permute.xlu0 %1069 }
 0x167   : > { %v1334_v28 = vsel %vm1306_vm13, %v1301_v35, %v1070_v36  ;;  %v1107_v47 = vsel %vm1075_vm6, %v3666_v13, %v752_v21  ;;  %vm2543_vm6 = vcmask 523264  }
 0x168   : > { %3125 = vmatmul.mubr.msk.bf16.gmra.mrb[24].mxu0 %vm1366_vm14, %v1334_v28 }
 0x16a   : > { %v865_v52 = vpop.permute.xlu1 %864  ;;  %v863_v33 = vpop.permute.xlu0 %862 }
 0x16b   : > { %v1140_v51 = vsel %vm1108_vm7, %v1107_v47, %v865_v52  ;;  %v1138_v57 = vsel %vm1108_vm7, %v1105_v46, %v863_v33 }
 0x16e   : > { %v898_v39 = vpop.permute.xlu1 %897  ;;  %v896_v40 = vpop.permute.xlu0 %895 }
 0x16f   : > { %v1173_v13 = vsel %vm1141_vm8, %v1140_v51, %v898_v39  ;;  %v1171_v56 = vsel %vm1141_vm8, %v1138_v57, %v896_v40  ;;  %vm2619_vm8 = vcmask 588800  }
 0x172   : > { %v942_v42 = vpop.permute.xlu1 %941  ;;  %v940_v1 = vpop.permute.xlu0 %939 }
 0x173   : > { %v1206_v60 = vsel %vm1174_vm9, %v1173_v13, %v942_v42  ;;  %v1204_v58 = vsel %vm1174_vm9, %v1171_v56, %v940_v1 }
 0x176   : > { %v978_v43 = vpop.permute.xlu1 %977  ;;  %v976_v45 = vpop.permute.xlu0 %975 }
 0x177   : > { %v1239_v4 = vsel %vm1207_vm10, %v1206_v60, %v978_v43  ;;  %v1237_v6 = vsel %vm1207_vm10, %v1204_v58, %v976_v45 }
 0x17a   : > { %v1010_v38 = vpop.permute.xlu1 %1009  ;;  %v1008_v48 = vpop.permute.xlu0 %1007 }
 0x17b   : > { %v1272_v8 = vsel %vm1240_vm11, %v1239_v4, %v1010_v38  ;;  %v1270_v63 = vsel %vm1240_vm11, %v1237_v6, %v1008_v48 }
 0x17c   : > { %v3102_v50 = vpop.f32.mrb[0].mxu0 }
 0x17d   : > { %v1446_v11 = vadd.f32 %v3102_v50, %v3831_v31  ;;  %v1437_v53 = vpop.f32.mrb[1].mxu0 }
 0x17e   : > { %v1438_v55 = vadd.f32 %v3831_v31, %v1437_v53  ;;  %v3103_v41 = vpop.f32.mrb[2].mxu0  ;;  %v1042_v59 = vpop.permute.xlu1 %1041 }
 0x17f   : > { %v1449_v61 = vadd.f32 %v3103_v41, %v3831_v31  ;;  %v1440_v49 = vpop.f32.mrb[3].mxu0  ;;  %v1040_v62 = vpop.permute.xlu0 %1039  ;;  %v1566_v30 = vmax.f32 %v1446_v11, 0.0  ;;  %v1305_v16 = vsel %vm1273_vm12, %v1272_v8, %v1042_v59 }
 0x180   : > { %v1441_v5 = vadd.f32 %v3831_v31, %v1440_v49  ;;  %v1564_v15 = vmax.f32 %v1438_v55, 0.0  ;;  %v1303_v7 = vsel %vm1273_vm12, %v1270_v63, %v1040_v62 }
 0x181   : > { %v1567_v0 = vmax.f32 %v1449_v61, 0.0 }
 0x182   : > { %v1565_v19 = vmax.f32 %v1441_v5, 0.0  ;;  %v1074_v37 = vpop.permute.xlu1 %1073 }
 0x183   : > { %v1597_v20 = vpack.c.bf16 %v1567_v0, %v1566_v30  ;;  %v1338_v27 = vsel %vm1306_vm13, %v1305_v16, %v1074_v37  ;;  %v1072_v22 = vpop.permute.xlu0 %1071  ;;  %v3216_v30 = vld [vmem:[%s4571_s3] sm:$0xff]   ;;  %v3217_v37 = vld [vmem:[%s4571_s3 + $0x8] sm:$0xff]  }
 0x184   : > { %v1596_v9 = vpack.c.bf16 %v1565_v19, %v1564_v15  ;;  %v1336_v23 = vsel %vm1306_vm13, %v1303_v7, %v1072_v22  ;;  %3132 = vmatprep.subr.bf16.mxu1 %v3216_v30 }
 0x185   : > { %v1620_v44 = vshrl.u32 %v1597_v20, 16  ;;  %3128 = vmatprep.mubr.msk.bf16.mxu0 %vm1366_vm14, %v1336_v23  ;;  %v1623_v26 = vshll.u32 %v1597_v20, 16  ;;  %3133 = vmatpush3.bf16.msra.mxu1 %v3216_v30 }
 0x186   : > { %v1613_v24 = vshrl.u32 %v1596_v9, 16  ;;  %3129 = vmatmul.mubr.msk.bf16.gmra.mrb[28].mxu0 %vm1366_vm14, %v1338_v27  ;;  %v1616_v12 = vshll.u32 %v1596_v9, 16  ;;  %3134 = vmatprep.subr.bf16.mxu1 %v3217_v37  ;;  %v3218_v9 = vld [vmem:[%s4571_s3 + $0x10] sm:$0xff]  }
 0x187   : > { %v1622_v17 = vrot.slane %v1620_v44, 7 }
 0x188   : > { %v1615_v32 = vrot.slane %v1613_v24, 7 }
 0x189   : > { %v1625_v14 = vor.u32 %v1623_v26, %v1622_v17  ;;  %v1773_v29 = vsel %vm3281_vm2, %v1622_v17, 0  ;;  %3135 = vmatpush3.bf16.msra.mxu1 %v3217_v37  ;;  %v3219_v26 = vld [vmem:[%s4571_s3 + $0x18] sm:$0xff]  }
 0x18a   : > { %v1618_v54 = vor.u32 %v1616_v12, %v1615_v32  ;;  %v2034_v21 = vrot.slane %v1773_v29, 1  ;;  %v1772_v28 = vsel %vm3281_vm2, %v1615_v32, 0  ;;  %v1808_v1 = vshll.u32 %v1773_v29, 16  ;;  %3136 = vmatprep.subr.bf16.mxu1 %v3218_v9 }
 0x18b   : > { %v3859_v25 = vsel %vm3281_vm2, 0, %v1625_v14  ;;  %v2031_v40 = vrot.slane %v1772_v28, 1  ;;  %v1796_v51 = vshll.u32 %v1772_v28, 16 }
 0x18c   : > { %2110 = vrot.lane.b32.xlu1 %v3859_v25, %s3234_s29  ;;  %2220 = vrot.lane.b32.xlu0 %v3859_v25, %s3239_s15  ;;  %v2033_v34 = vrot.slane %v3859_v25, 1  ;;  %v3868_v35 = vsel %vm3281_vm2, 0, %v1618_v54  ;;  %v1803_v36 = vshll.u32 %v3859_v25, 16  ;;  %v1801_v42 = vshrl.u32 %v3859_v25, 16 }
 0x18d   : > { %v2030_v33 = vrot.slane %v3868_v35, 1  ;;  %v1791_v47 = vshll.u32 %v3868_v35, 16  ;;  %v1810_v38 = vrot.slane %v1808_v1, 1  ;;  %v1789_v46 = vshrl.u32 %v3868_v35, 16  ;;  %3137 = vmatpush3.bf16.msra.mxu1 %v3218_v9 }
 0x18e   : > { %v2035_v52 = vsel %vm785_vm3, %v2033_v34, %v2034_v21  ;;  %v1805_v39 = vrot.slane %v1803_v36, 1  ;;  %v1798_v55 = vrot.slane %v1796_v51, 1  ;;  %3138 = vmatprep.subr.bf16.mxu1 %v3219_v26  ;;  %v3220_v34 = vld [vmem:[%s4571_s3 + $0x20] ss:$0 sps:$4 sm:$0xff]  }
 0x18f   : > { %v2032_v43 = vsel %vm785_vm3, %v2030_v33, %v2031_v40  ;;  %v1793_v50 = vrot.slane %v1791_v47, 1 }
 0x190   : > { %2190 = vrot.lane.b32.xlu1 %v2035_v52, %s3240_s16  ;;  %2108 = vrot.lane.b32.xlu0 %v3868_v35, %s3234_s29  ;;  %v1806_v45 = vor.u32 %v1805_v39, %v1801_v42 }
 0x191   : > { %v1794_v11 = vor.u32 %v1793_v50, %v1789_v46  ;;  %3139 = vmatpush3.bf16.msra.mxu1 %v3219_v26 }
 0x192   : > { %v1811_v48 = vsel %vm528_vm4, %v1806_v45, %v1810_v38  ;;  %3175 = vmatprep.subr.msk.bf16.mxu1 %vm2652_vm15, %v3220_v34 }
 0x193   : > { %v1799_v61 = vsel %vm528_vm4, %v1794_v11, %v1798_v55 }
 0x194   : > { %2077 = vrot.lane.b32.xlu1 %v2032_v43, %s3236_s8  ;;  %2284 = vrot.lane.b32.xlu0 %v2035_v52, %s3241_s17 }
 0x198   : > { %2154 = vrot.lane.b32.xlu1 %v1811_v48, %s3238_s10  ;;  %2079 = vrot.lane.b32.xlu0 %v2035_v52, %s3236_s8  ;;  %v2654_v52 = vsel %vm2652_vm15, %v3220_v34, 0 }
 0x199   : > { %3141 = vmatpush3.bf16.msra.mxu1 %v2654_v52 }
 0x19c   : > { %1972 = vrot.lane.b32.xlu1 %v1811_v48, %s3231_s24  ;;  %v3106_v53 = vpop.f32.mrb[4].mxu0  ;;  %2188 = vrot.lane.b32.xlu0 %v2032_v43, %s3240_s16 }
 0x19d   : > { %v1462_v57 = vadd.f32 %v3106_v53, %v3831_v31  ;;  %v1453_v13 = vpop.f32.mrb[5].mxu0 }
 0x19e   : > { %v1454_v41 = vadd.f32 %v3831_v31, %v1453_v13  ;;  %v3107_v59 = vpop.f32.mrb[6].mxu0 }
 0x19f   : > { %v1465_v56 = vadd.f32 %v3107_v59, %v3831_v31  ;;  %v1456_v60 = vpop.f32.mrb[7].mxu0  ;;  %v1570_v62 = vmax.f32 %v1462_v57, 0.0 }
 0x1a0   : > { %v1457_v49 = vadd.f32 %v3831_v31, %v1456_v60  ;;  %1970 = vrot.lane.b32.xlu1 %v1799_v61, %s3231_s24  ;;  %2252 = vrot.lane.b32.xlu0 %v1811_v48, %s3242_s20  ;;  %v1568_v4 = vmax.f32 %v1454_v41, 0.0 }
 0x1a1   : > { %v1571_v58 = vmax.f32 %v1465_v56, 0.0 }
 0x1a2   : > { %v1569_v5 = vmax.f32 %v1457_v49, 0.0 }
 0x1a3   : > { %v1599_v6 = vpack.c.bf16 %v1571_v58, %v1570_v62 }
 0x1a4   : > { %v1598_v8 = vpack.c.bf16 %v1569_v5, %v1568_v4  ;;  %2152 = vrot.lane.b32.xlu0 %v1799_v61, %s3238_s10 }
 0x1a5   : > { %v1634_v0 = vshrl.u32 %v1599_v6, 16  ;;  %v1637_v16 = vshll.u32 %v1599_v6, 16 }
 0x1a6   : > { %v1627_v63 = vshrl.u32 %v1598_v8, 16  ;;  %v1630_v7 = vshll.u32 %v1598_v8, 16 }
 0x1a7   : > { %v1636_v15 = vrot.slane %v1634_v0, 7 }
 0x1a8   : > { %v1629_v19 = vrot.slane %v1627_v63, 7 }
 0x1a9   : > { %v1639_v20 = vor.u32 %v1637_v16, %v1636_v15  ;;  %v1775_v23 = vsel %vm3281_vm2, %v1636_v15, 0 }
 0x1aa   : > { %v1632_v27 = vor.u32 %v1630_v7, %v1629_v19  ;;  %v2040_v32 = vrot.slane %v1775_v23, 1  ;;  %v1774_v12 = vsel %vm3281_vm2, %v1629_v19, 0  ;;  %v1832_v28 = vshll.u32 %v1775_v23, 16 }
 0x1ab   : > { %v3905_v22 = vsel %vm3281_vm2, 0, %v1639_v20  ;;  %v2037_v21 = vrot.slane %v1774_v12, 1  ;;  %v1820_v50 = vshll.u32 %v1774_v12, 16 }
 0x1ac   : > { %2114 = vrot.lane.b32.xlu1 %v3905_v22, %s3234_s29  ;;  %2224 = vrot.lane.b32.xlu0 %v3905_v22, %s3239_s15  ;;  %v3918_v44 = vsel %vm3281_vm2, 0, %v1632_v27  ;;  %v2039_v24 = vrot.slane %v3905_v22, 1  ;;  %v1827_v17 = vshll.u32 %v3905_v22, 16  ;;  %v1825_v36 = vshrl.u32 %v3905_v22, 16 }
 0x1ad   : > { %v2036_v29 = vrot.slane %v3918_v44, 1  ;;  %v1815_v40 = vshll.u32 %v3918_v44, 16  ;;  %v1834_v42 = vrot.slane %v1832_v28, 1  ;;  %v1813_v48 = vshrl.u32 %v3918_v44, 16 }
 0x1ae   : > { %v2041_v14 = vsel %vm785_vm3, %v2039_v24, %v2040_v32  ;;  %v1829_v54 = vrot.slane %v1827_v17, 1  ;;  %v1822_v59 = vrot.slane %v1820_v50, 1 }
 0x1af   : > { %v2038_v33 = vsel %vm785_vm3, %v2036_v29, %v2037_v21  ;;  %v1817_v43 = vrot.slane %v1815_v40, 1 }
 0x1b0   : > { %2222 = vrot.lane.b32.xlu1 %v3918_v44, %s3239_s15  ;;  %2112 = vrot.lane.b32.xlu0 %v3918_v44, %s3234_s29  ;;  %v1830_v39 = vor.u32 %v1829_v54, %v1825_v36 }
 0x1b1   : > { %v1818_v57 = vor.u32 %v1817_v43, %v1813_v48 }
 0x1b2   : > { %v1835_v1 = vsel %vm528_vm4, %v1830_v39, %v1834_v42 }
 0x1b3   : > { %v1823_v49 = vsel %vm528_vm4, %v1818_v57, %v1822_v59 }
 0x1b4   : > { %2194 = vrot.lane.b32.xlu1 %v2041_v14, %s3240_s16  ;;  %2288 = vrot.lane.b32.xlu0 %v2041_v14, %s3241_s17 }
 0x1b8   : > { %2081 = vrot.lane.b32.xlu1 %v2038_v33, %s3236_s8  ;;  %2083 = vrot.lane.b32.xlu0 %v2041_v14, %s3236_s8 }
 0x1bc   : > { %2158 = vrot.lane.b32.xlu1 %v1835_v1, %s3238_s10  ;;  %v3110_v45 = vpop.f32.mrb[8].mxu0  ;;  %2286 = vrot.lane.b32.xlu0 %v2038_v33, %s3241_s17 }
 0x1bd   : > { %v1478_v47 = vadd.f32 %v3110_v45, %v3831_v31  ;;  %v1469_v38 = vpop.f32.mrb[9].mxu0 }
 0x1be   : > { %v1470_v46 = vadd.f32 %v3831_v31, %v1469_v38  ;;  %v3111_v51 = vpop.f32.mrb[10].mxu0 }
 0x1bf   : > { %v1481_v11 = vadd.f32 %v3111_v51, %v3831_v31  ;;  %v1472_v53 = vpop.f32.mrb[11].mxu0  ;;  %v1574_v55 = vmax.f32 %v1478_v47, 0.0 }
 0x1c0   : > { %v1473_v13 = vadd.f32 %v3831_v31, %v1472_v53  ;;  %1976 = vrot.lane.b32.xlu1 %v1835_v1, %s3231_s24  ;;  %2192 = vrot.lane.b32.xlu0 %v2038_v33, %s3240_s16  ;;  %v1572_v56 = vmax.f32 %v1470_v46, 0.0 }
 0x1c1   : > { %v1575_v41 = vmax.f32 %v1481_v11, 0.0 }
 0x1c2   : > { %v1573_v60 = vmax.f32 %v1473_v13, 0.0 }
 0x1c3   : > { %v1601_v61 = vpack.c.bf16 %v1575_v41, %v1574_v55 }
 0x1c4   : > { %v1600_v62 = vpack.c.bf16 %v1573_v60, %v1572_v56  ;;  %2254 = vrot.lane.b32.xlu1 %v1823_v49, %s3242_s20  ;;  %2256 = vrot.lane.b32.xlu0 %v1835_v1, %s3242_s20 }
 0x1c5   : > { %v1648_v58 = vshrl.u32 %v1601_v61, 16  ;;  %v1651_v6 = vshll.u32 %v1601_v61, 16 }
 0x1c6   : > { %v1641_v4 = vshrl.u32 %v1600_v62, 16  ;;  %v1644_v0 = vshll.u32 %v1600_v62, 16 }
 0x1c7   : > { %v1650_v5 = vrot.slane %v1648_v58, 7 }
 0x1c8   : > { %v1643_v8 = vrot.slane %v1641_v4, 7  ;;  %1974 = vrot.lane.b32.xlu1 %v1823_v49, %s3231_s24  ;;  %2156 = vrot.lane.b32.xlu0 %v1823_v49, %s3238_s10 }
 0x1c9   : > { %v1653_v30 = vor.u32 %v1651_v6, %v1650_v5  ;;  %v1777_v16 = vsel %vm3281_vm2, %v1650_v5, 0 }
 0x1ca   : > { %v1646_v63 = vor.u32 %v1644_v0, %v1643_v8  ;;  %v2046_v7 = vrot.slane %v1777_v16, 1  ;;  %v1776_v27 = vsel %vm3281_vm2, %v1643_v8, 0  ;;  %v1856_v32 = vshll.u32 %v1777_v16, 16 }
 0x1cb   : > { %v3960_v15 = vsel %vm3281_vm2, 0, %v1653_v30  ;;  %v2043_v17 = vrot.slane %v1776_v27, 1  ;;  %v1844_v39 = vshll.u32 %v1776_v27, 16 }
 0x1cc   : > { %2118 = vrot.lane.b32.xlu1 %v3960_v15, %s3234_s29  ;;  %2228 = vrot.lane.b32.xlu0 %v3960_v15, %s3239_s15  ;;  %v3970_v19 = vsel %vm3281_vm2, 0, %v1646_v63  ;;  %v2045_v37 = vrot.slane %v3960_v15, 1  ;;  %v1851_v20 = vshll.u32 %v3960_v15, 16  ;;  %v1849_v26 = vshrl.u32 %v3960_v15, 16  ;;  %v4027_v63 = vpop.permute.xlu0 %1968 }
 0x1cd   : > { %v2042_v23 = vrot.slane %v3970_v19, 1  ;;  %v1839_v29 = vshll.u32 %v3970_v19, 16  ;;  %v1858_v54 = vrot.slane %v1856_v32, 1  ;;  %v1837_v33 = vshrl.u32 %v3970_v19, 16 }
 0x1ce   : > { %v2047_v9 = vsel %vm785_vm3, %v2045_v37, %v2046_v7  ;;  %v1853_v24 = vrot.slane %v1851_v20, 1  ;;  %v1846_v50 = vrot.slane %v1844_v39, 1 }
 0x1cf   : > { %v2044_v12 = vsel %vm785_vm3, %v2042_v23, %v2043_v17  ;;  %v1841_v21 = vrot.slane %v1839_v29, 1 }
 0x1d0   : > { %2226 = vrot.lane.b32.xlu1 %v3970_v19, %s3239_s15  ;;  %2116 = vrot.lane.b32.xlu0 %v3970_v19, %s3234_s29  ;;  %v1854_v14 = vor.u32 %v1853_v24, %v1849_v26  ;;  %v4037_v17 = vpop.permute.xlu0 %2075 }
 0x1d1   : > { %v1842_v45 = vor.u32 %v1841_v21, %v1837_v33 }
 0x1d2   : > { %v1859_v34 = vsel %vm528_vm4, %v1854_v14, %v1858_v54 }
 0x1d3   : > { %v1847_v53 = vsel %vm528_vm4, %v1842_v45, %v1846_v50 }
 0x1d4   : > { %2198 = vrot.lane.b32.xlu1 %v2047_v9, %s3240_s16  ;;  %2292 = vrot.lane.b32.xlu0 %v2047_v9, %s3241_s17 }
 0x1d8   : > { %2085 = vrot.lane.b32.xlu1 %v2044_v12, %s3236_s8  ;;  %2087 = vrot.lane.b32.xlu0 %v2047_v9, %s3236_s8 }
 0x1dc   : > { %2162 = vrot.lane.b32.xlu1 %v1859_v34, %s3238_s10  ;;  %v3114_v36 = vpop.f32.mrb[12].mxu0  ;;  %2290 = vrot.lane.b32.xlu0 %v2044_v12, %s3241_s17 }
 0x1dd   : > { %v1494_v28 = vadd.f32 %v3114_v36, %v3831_v31  ;;  %v1485_v52 = vpop.f32.mrb[13].mxu0 }
 0x1de   : > { %v1486_v40 = vadd.f32 %v3831_v31, %v1485_v52  ;;  %v3115_v42 = vpop.f32.mrb[14].mxu0 }
 0x1df   : > { %v1497_v1 = vadd.f32 %v3115_v42, %v3831_v31  ;;  %v1488_v43 = vpop.f32.mrb[15].mxu0  ;;  %v1578_v38 = vmax.f32 %v1494_v28, 0.0 }
 0x1e0   : > { %v1489_v47 = vadd.f32 %v3831_v31, %v1488_v43  ;;  %1980 = vrot.lane.b32.xlu1 %v1859_v34, %s3231_s24  ;;  %2196 = vrot.lane.b32.xlu0 %v2044_v12, %s3240_s16  ;;  %v1576_v46 = vmax.f32 %v1486_v40, 0.0 }
 0x1e1   : > { %v1579_v48 = vmax.f32 %v1497_v1, 0.0 }
 0x1e2   : > { %v1577_v51 = vmax.f32 %v1489_v47, 0.0 }
 0x1e3   : > { %v1603_v11 = vpack.c.bf16 %v1579_v48, %v1578_v38 }
 0x1e4   : > { %v1602_v57 = vpack.c.bf16 %v1577_v51, %v1576_v46  ;;  %2258 = vrot.lane.b32.xlu1 %v1847_v53, %s3242_s20  ;;  %2260 = vrot.lane.b32.xlu0 %v1859_v34, %s3242_s20 }
 0x1e5   : > { %v1662_v13 = vshrl.u32 %v1603_v11, 16  ;;  %v1665_v59 = vshll.u32 %v1603_v11, 16 }
 0x1e6   : > { %v1655_v55 = vshrl.u32 %v1602_v57, 16  ;;  %v1658_v61 = vshll.u32 %v1602_v57, 16 }
 0x1e7   : > { %v1664_v41 = vrot.slane %v1662_v13, 7 }
 0x1e8   : > { %v1657_v56 = vrot.slane %v1655_v55, 7  ;;  %1978 = vrot.lane.b32.xlu1 %v1847_v53, %s3231_s24  ;;  %2160 = vrot.lane.b32.xlu0 %v1847_v53, %s3238_s10 }
 0x1e9   : > { %v1667_v60 = vor.u32 %v1665_v59, %v1664_v41  ;;  %v1779_v58 = vsel %vm3281_vm2, %v1664_v41, 0 }
 0x1ea   : > { %v1660_v49 = vor.u32 %v1658_v61, %v1657_v56  ;;  %v2052_v8 = vrot.slane %v1779_v58, 1  ;;  %v1778_v30 = vsel %vm3281_vm2, %v1657_v56, 0  ;;  %v1880_v27 = vshll.u32 %v1779_v58, 16 }
 0x1eb   : > { %v4006_v62 = vsel %vm3281_vm2, 0, %v1667_v60  ;;  %v2049_v20 = vrot.slane %v1778_v30, 1  ;;  %v1868_v21 = vshll.u32 %v1778_v30, 16 }
 0x1ec   : > { %2122 = vrot.lane.b32.xlu1 %v4006_v62, %s3234_s29  ;;  %2232 = vrot.lane.b32.xlu0 %v4006_v62, %s3239_s15  ;;  %v4016_v4 = vsel %vm3281_vm2, 0, %v1660_v49  ;;  %v2051_v5 = vrot.slane %v4006_v62, 1  ;;  %v1875_v6 = vshll.u32 %v4006_v62, 16  ;;  %v1873_v7 = vshrl.u32 %v4006_v62, 16 }
 0x1ed   : > { %v2048_v16 = vrot.slane %v4016_v4, 1  ;;  %v1863_v24 = vshll.u32 %v4016_v4, 16  ;;  %v1882_v26 = vrot.slane %v1880_v27, 1  ;;  %v1861_v34 = vshrl.u32 %v4016_v4, 16 }
 0x1ee   : > { %v2053_v0 = vsel %vm785_vm3, %v2051_v5, %v2052_v8  ;;  %v1877_v37 = vrot.slane %v1875_v6, 1  ;;  %v1870_v47 = vrot.slane %v1868_v21, 1 }
 0x1ef   : > { %v2050_v9 = vsel %vm785_vm3, %v2048_v16, %v2049_v20  ;;  %v1865_v12 = vrot.slane %v1863_v24, 1 }
 0x1f0   : > { %2230 = vrot.lane.b32.xlu1 %v4016_v4, %s3239_s15  ;;  %2120 = vrot.lane.b32.xlu0 %v4016_v4, %s3234_s29  ;;  %v1878_v23 = vor.u32 %v1877_v37, %v1873_v7  ;;  %v2317_v7 = vsel %vm1108_vm7, %v3287_v3, %v4027_v63 }
 0x1f1   : > { %v1866_v42 = vor.u32 %v1865_v12, %v1861_v34  ;;  %v2349_v12 = vsel %vm1174_vm9, %v2317_v7, %v4037_v17 }
 0x1f2   : > { %v1883_v32 = vsel %vm528_vm4, %v1878_v23, %v1882_v26 }
 0x1f3   : > { %v1871_v11 = vsel %vm528_vm4, %v1866_v42, %v1870_v47 }
 0x1f4   : > { %2202 = vrot.lane.b32.xlu1 %v2053_v0, %s3240_s16  ;;  %2296 = vrot.lane.b32.xlu0 %v2053_v0, %s3241_s17 }
 0x1f8   : > { %2089 = vrot.lane.b32.xlu1 %v2050_v9, %s3236_s8  ;;  %2091 = vrot.lane.b32.xlu0 %v2053_v0, %s3236_s8 }
 0x1fb   : > { %v3118_v14 = vpop.f32.mrb[16].mxu0 }
 0x1fc   : > { %2166 = vrot.lane.b32.xlu1 %v1883_v32, %s3238_s10  ;;  %2294 = vrot.lane.b32.xlu0 %v2050_v9, %s3241_s17  ;;  %v1510_v29 = vadd.f32 %v3118_v14, %v3831_v31  ;;  %v1501_v54 = vpop.f32.mrb[17].mxu0 }
 0x1fd   : > { %v1502_v36 = vadd.f32 %v3831_v31, %v1501_v54  ;;  %v3119_v52 = vpop.f32.mrb[18].mxu0 }
 0x1fe   : > { %v4045_v28 = vpop.permute.xlu1 %2110  ;;  %v1513_v33 = vadd.f32 %v3119_v52, %v3831_v31  ;;  %v4048_v39 = vpop.permute.xlu0 %2220  ;;  %v1582_v43 = vmax.f32 %v1510_v29, 0.0 }
 0x1ff   : > { %v1504_v40 = vpop.f32.mrb[19].mxu0  ;;  %v1580_v38 = vmax.f32 %v1502_v36, 0.0 }
 0x200   : > { %v1505_v1 = vadd.f32 %v3831_v31, %v1504_v40  ;;  %1984 = vrot.lane.b32.xlu1 %v1883_v32, %s3231_s24  ;;  %2200 = vrot.lane.b32.xlu0 %v2050_v9, %s3240_s16  ;;  %v1583_v45 = vmax.f32 %v1513_v33, 0.0 }
 0x202   : > { %v1581_v48 = vmax.f32 %v1505_v1, 0.0  ;;  %v4053_v50 = vpop.permute.xlu1 %2190  ;;  %v1605_v46 = vpack.c.bf16 %v1583_v45, %v1582_v43  ;;  %v2109_v51 = vpop.permute.xlu0 %2108 }
 0x203   : > { %v2381_v34 = vsel %vm1240_vm11, %v2349_v12, %v2109_v51 }
 0x204   : > { %v1604_v53 = vpack.c.bf16 %v1581_v48, %v1580_v38  ;;  %2262 = vrot.lane.b32.xlu1 %v1871_v11, %s3242_s20  ;;  %2264 = vrot.lane.b32.xlu0 %v1883_v32, %s3242_s20  ;;  %v1676_v57 = vshrl.u32 %v1605_v46, 16  ;;  %v1679_v41 = vshll.u32 %v1605_v46, 16 }
 0x206   : > { %v1669_v13 = vshrl.u32 %v1604_v53, 16  ;;  %v1678_v55 = vrot.slane %v1676_v57, 7  ;;  %v2285_v59 = vpop.permute.xlu0 %2284  ;;  %v4058_v60 = vpop.permute.xlu1 %2077  ;;  %v1672_v49 = vshll.u32 %v1604_v53, 16 }
 0x208   : > { %v1671_v56 = vrot.slane %v1669_v13, 7  ;;  %1982 = vrot.lane.b32.xlu1 %v1871_v11, %s3231_s24  ;;  %2164 = vrot.lane.b32.xlu0 %v1871_v11, %s3238_s10  ;;  %v1681_v61 = vor.u32 %v1679_v41, %v1678_v55  ;;  %v1781_v8 = vsel %vm3281_vm2, %v1678_v55, 0 }
 0x209   : > { %v2058_v27 = vrot.slane %v1781_v8, 1  ;;  %v1904_v54 = vshll.u32 %v1781_v8, 16 }
 0x20a   : > { %v1674_v58 = vor.u32 %v1672_v49, %v1671_v56  ;;  %v4062_v5 = vpop.permute.xlu0 %2079  ;;  %v4066_v6 = vsel %vm3281_vm2, 0, %v1681_v61  ;;  %v4074_v30 = vpop.permute.xlu1 %2154  ;;  %v1780_v9 = vsel %vm3281_vm2, %v1671_v56, 0 }
 0x20b   : > { %v2057_v37 = vrot.slane %v4066_v6, 1  ;;  %v1899_v20 = vshll.u32 %v4066_v6, 16  ;;  %v2055_v63 = vrot.slane %v1780_v9, 1  ;;  %v1897_v29 = vshrl.u32 %v4066_v6, 16 }
 0x20c   : > { %2126 = vrot.lane.b32.xlu1 %v4066_v6, %s3234_s29  ;;  %2236 = vrot.lane.b32.xlu0 %v4066_v6, %s3239_s15  ;;  %v4078_v16 = vsel %vm3281_vm2, 0, %v1674_v58  ;;  %v1906_v42 = vrot.slane %v1904_v54, 1  ;;  %v1892_v53 = vshll.u32 %v1780_v9, 16 }
 0x20d   : > { %v4092_v24 = vsel %vm785_vm3, %v2057_v37, %v2058_v27  ;;  %v2054_v26 = vrot.slane %v4078_v16, 1  ;;  %v1901_v32 = vrot.slane %v1899_v20, 1  ;;  %v1887_v52 = vshll.u32 %v4078_v16, 16 }
 0x20e   : > { %v2189_v0 = vpop.permute.xlu0 %2188  ;;  %v4097_v14 = vpop.permute.xlu1 %1972 }
 0x20f   : > { %v2056_v36 = vsel %vm785_vm3, %v2054_v26, %v2055_v63  ;;  %v1902_v17 = vor.u32 %v1901_v32, %v1897_v29  ;;  %v1889_v38 = vrot.slane %v1887_v52, 1 }
 0x210   : > { %2234 = vrot.lane.b32.xlu1 %v4078_v16, %s3239_s15  ;;  %2124 = vrot.lane.b32.xlu0 %v4078_v16, %s3234_s29 }
 0x211   : > { %v1907_v45 = vsel %vm528_vm4, %v1902_v17, %v1906_v42 }
 0x212   : > { %v2253_v23 = vpop.permute.xlu0 %2252  ;;  %v1971_v1 = vpop.permute.xlu1 %1970 }
 0x214   : > { %2206 = vrot.lane.b32.xlu1 %v4092_v24, %s3240_s16  ;;  %2300 = vrot.lane.b32.xlu0 %v4092_v24, %s3241_s17 }
 0x216   : > { %v2153_v21 = vpop.permute.xlu0 %2152 }
 0x217   : > { %v2413_v33 = vsel %vm1306_vm13, %v2381_v34, %v2153_v21 }
 0x218   : > { %2093 = vrot.lane.b32.xlu1 %v2056_v36, %s3236_s8  ;;  %2298 = vrot.lane.b32.xlu0 %v2056_v36, %s3241_s17  ;;  %v2446_v40 = vsel %vm2444_vm0, %v2413_v33, %v2189_v0  ;;  %v1894_v0 = vrot.slane %v1892_v53, 1 }
 0x219   : > { %v2479_v43 = vsel %vm2477_vm1, %v2446_v40, %v4048_v39  ;;  %v1885_v39 = vshrl.u32 %v4078_v16, 16 }
 0x21a   : > { %v2512_v47 = vsel %vm2510_vm5, %v2479_v43, %v2253_v23 }
 0x21b   : > { %v3122_v48 = vpop.f32.mrb[20].mxu0  ;;  %v2545_v46 = vsel %vm2543_vm6, %v2512_v47, %v2285_v59  ;;  %v1890_v49 = vor.u32 %v1889_v38, %v1885_v39 }
 0x21c   : > { %2170 = vrot.lane.b32.xlu1 %v1907_v45, %s3238_s10  ;;  %2204 = vrot.lane.b32.xlu0 %v2056_v36, %s3240_s16  ;;  %v1526_v51 = vadd.f32 %v3122_v48, %v3831_v31  ;;  %v1517_v11 = vpop.f32.mrb[21].mxu0  ;;  %v2319_v36 = vsel %vm1108_vm7, %v3868_v35, %v1971_v1 }
 0x21d   : > { %3142 = vmatprep.mubr.msk.bf16.mxu1 %vm2619_vm8, %v2545_v46  ;;  %v1518_v57 = vadd.f32 %v3831_v31, %v1517_v11  ;;  %v3123_v55 = vpop.f32.mrb[22].mxu0  ;;  %v1895_v23 = vsel %vm528_vm4, %v1890_v49, %v1894_v0  ;;  %v2351_v43 = vsel %vm1174_vm9, %v2319_v36, %v4058_v60 }
 0x21e   : > { %v4122_v13 = vpop.permute.xlu1 %2114  ;;  %v1529_v41 = vadd.f32 %v3123_v55, %v3831_v31  ;;  %v4125_v56 = vpop.permute.xlu0 %2224  ;;  %v1586_v58 = vmax.f32 %v1526_v51, 0.0  ;;  %v2383_v51 = vsel %vm1240_vm11, %v2351_v43, %v4045_v28 }
 0x21f   : > { %v1520_v61 = vpop.f32.mrb[23].mxu0  ;;  %v1584_v37 = vmax.f32 %v1518_v57, 0.0 }
 0x220   : > { %v1521_v59 = vadd.f32 %v3831_v31, %v1520_v61  ;;  %1988 = vrot.lane.b32.xlu1 %v1907_v45, %s3231_s24  ;;  %2268 = vrot.lane.b32.xlu0 %v1907_v45, %s3242_s20  ;;  %v1587_v8 = vmax.f32 %v1529_v41, 0.0  ;;  %v2415_v61 = vsel %vm1306_vm13, %v2383_v51, %v4074_v30  ;;  %v2321_v30 = vsel %vm1108_vm7, %v3859_v25, %v4097_v14 }
 0x222   : > { %v1585_v20 = vmax.f32 %v1521_v59, 0.0  ;;  %v2223_v7 = vpop.permute.xlu1 %2222  ;;  %v1607_v27 = vpack.c.bf16 %v1587_v8, %v1586_v58  ;;  %v2113_v9 = vpop.permute.xlu0 %2112  ;;  %v2448_v8 = vsel %vm2444_vm0, %v2415_v61, %v4053_v50 }
 0x223   : > { %v2481_v0 = vsel %vm2477_vm1, %v2448_v8, %v2223_v7  ;;  %v2353_v7 = vsel %vm1174_vm9, %v2321_v30, %v4062_v5 }
 0x224   : > { %v1606_v26 = vpack.c.bf16 %v1585_v20, %v1584_v37  ;;  %2266 = vrot.lane.b32.xlu1 %v1895_v23, %s3242_s20  ;;  %2168 = vrot.lane.b32.xlu0 %v1895_v23, %s3238_s10  ;;  %v1690_v32 = vshrl.u32 %v1607_v27, 16  ;;  %v1693_v17 = vshll.u32 %v1607_v27, 16 }
 0x226   : > { %v1683_v12 = vshrl.u32 %v1606_v26, 16  ;;  %v4133_v63 = vpop.permute.xlu1 %2194  ;;  %v4135_v29 = vpop.permute.xlu0 %2288  ;;  %v1692_v54 = vrot.slane %v1690_v32, 7  ;;  %v1686_v21 = vshll.u32 %v1606_v26, 16  ;;  %v2385_v32 = vsel %vm1240_vm11, %v2353_v7, %v2113_v9 }
 0x228   : > { %v1685_v34 = vrot.slane %v1683_v12, 7  ;;  %1986 = vrot.lane.b32.xlu1 %v1895_v23, %s3231_s24  ;;  %v1695_v45 = vor.u32 %v1693_v17, %v1692_v54  ;;  %v1783_v20 = vsel %vm3281_vm2, %v1692_v54, 0 }
 0x229   : > { %v1928_v26 = vshll.u32 %v1783_v20, 16 }
 0x22a   : > { %v1688_v52 = vor.u32 %v1686_v21, %v1685_v34  ;;  %v1782_v33 = vsel %vm3281_vm2, %v1685_v34, 0  ;;  %v4142_v40 = vpop.permute.xlu1 %2081  ;;  %v4144_v42 = vpop.permute.xlu0 %2083  ;;  %v4166_v41 = vsel %vm3281_vm2, 0, %v1695_v45 }
 0x22b   : > { %v2061_v1 = vrot.slane %v1782_v33, 1  ;;  %v1916_v48 = vshll.u32 %v1782_v33, 16  ;;  %v1923_v58 = vshll.u32 %v4166_v41, 16  ;;  %v1921_v14 = vshrl.u32 %v4166_v41, 16 }
 0x22c   : > { %v4150_v47 = vsel %vm3281_vm2, 0, %v1688_v52  ;;  %v1930_v45 = vrot.slane %v1928_v26, 1 }
 0x22d   : > { %2238 = vrot.lane.b32.xlu1 %v4150_v47, %s3239_s15  ;;  %v2060_v35 = vrot.slane %v4150_v47, 1  ;;  %v1911_v38 = vshll.u32 %v4150_v47, 16  ;;  %v1909_v39 = vshrl.u32 %v4150_v47, 16  ;;  %v1918_v55 = vrot.slane %v1916_v48, 1 }
 0x22e   : > { %v4156_v46 = vpop.permute.xlu1 %2158  ;;  %v2287_v60 = vpop.permute.xlu0 %2286  ;;  %v1925_v23 = vrot.slane %v1923_v58, 1 }
 0x22f   : > { %v2062_v11 = vsel %vm785_vm3, %v2060_v35, %v2061_v1  ;;  %v1913_v53 = vrot.slane %v1911_v38, 1 }
 0x230   : > { %2302 = vrot.lane.b32.xlu0 %v2062_v11, %s3241_s17  ;;  %v1926_v21 = vor.u32 %v1925_v23, %v1921_v14 }
 0x231   : > { %2097 = vrot.lane.b32.xlu1 %v2062_v11, %s3236_s8  ;;  %v1914_v57 = vor.u32 %v1913_v53, %v1909_v39  ;;  %v2063_v39 = vrot.slane %v4166_v41, 1 }
 0x232   : > { %v4170_v28 = vpop.permute.xlu1 %1976  ;;  %v2193_v49 = vpop.permute.xlu0 %2192 }
 0x233   : > { %v1919_v59 = vsel %vm528_vm4, %v1914_v57, %v1918_v55 }
 0x234   : > { %2095 = vrot.lane.b32.xlu0 %v4092_v24, %s3236_s8 }
 0x235   : > { %2270 = vrot.lane.b32.xlu1 %v1919_v59, %s3242_s20 }
 0x236   : > { %v2255_v37 = vpop.permute.xlu1 %2254  ;;  %v2257_v24 = vpop.permute.xlu0 %2256 }
 0x237   : > { %v2514_v27 = vsel %vm2510_vm5, %v2481_v0, %v2255_v37 }
 0x238   : > { %2128 = vrot.lane.b32.xlu0 %v4150_v47, %s3234_s29  ;;  %v2547_v50 = vsel %vm2543_vm6, %v2514_v27, %v2287_v60  ;;  %v1931_v60 = vsel %vm528_vm4, %v1926_v21, %v1930_v45 }
 0x239   : > { %1990 = vrot.lane.b32.xlu1 %v1919_v59, %s3231_s24  ;;  %3143 = vmatmul.mubr.msk.bf16.vlgmr.msra.gmra.mrb[0].mxu1 %vm2619_vm8, %v2547_v50 }
 0x23a   : > { %v1975_v25 = vpop.permute.xlu1 %1974  ;;  %v2157_v12 = vpop.permute.xlu0 %2156 }
 0x23b   : > { %v2417_v54 = vsel %vm1306_vm13, %v2385_v32, %v2157_v12  ;;  %v3126_v34 = vpop.f32.mrb[24].mxu0 }
 0x23c   : > { %2172 = vrot.lane.b32.xlu0 %v1919_v59, %s3238_s10  ;;  %v2450_v36 = vsel %vm2444_vm0, %v2417_v54, %v2193_v49  ;;  %v1542_v17 = vadd.f32 %v3126_v34, %v3831_v31  ;;  %v1533_v5 = vpop.f32.mrb[25].mxu0  ;;  %v2064_v59 = vrot.slane %v1783_v20, 1  ;;  %v2323_v20 = vsel %vm1108_vm7, %v3918_v44, %v1975_v25 }
 0x23d   : > { %2130 = vrot.lane.b32.xlu1 %v4166_v41, %s3234_s29  ;;  %v2483_v52 = vsel %vm2477_vm1, %v2450_v36, %v4125_v56  ;;  %v1534_v9 = vadd.f32 %v3831_v31, %v1533_v5  ;;  %v3127_v43 = vpop.f32.mrb[26].mxu0  ;;  %v2355_v14 = vsel %vm1174_vm9, %v2323_v20, %v4142_v40 }
 0x23e   : > { %v4204_v33 = vpop.permute.xlu1 %2118  ;;  %v1545_v35 = vadd.f32 %v3127_v43, %v3831_v31  ;;  %v4207_v1 = vpop.permute.xlu0 %2228  ;;  %v2516_v48 = vsel %vm2510_vm5, %v2483_v52, %v2257_v24  ;;  %v1590_v53 = vmax.f32 %v1542_v17, 0.0  ;;  %v2387_v40 = vsel %vm1240_vm11, %v2355_v14, %v4122_v13 }
 0x23f   : > { %v1536_v38 = vpop.f32.mrb[27].mxu0  ;;  %v2549_v56 = vsel %vm2543_vm6, %v2516_v48, %v4135_v29  ;;  %v1588_v55 = vmax.f32 %v1534_v9, 0.0  ;;  %v2065_v29 = vsel %vm785_vm3, %v2063_v39, %v2064_v59 }
 0x240   : > { %v1537_v51 = vadd.f32 %v3831_v31, %v1536_v38  ;;  %2208 = vrot.lane.b32.xlu0 %v2062_v11, %s3240_s16  ;;  %v1591_v57 = vmax.f32 %v1545_v35, 0.0  ;;  %3146 = vmatprep.mubr.msk.bf16.mxu1 %vm2619_vm8, %v2549_v56  ;;  %v2419_v35 = vsel %vm1306_vm13, %v2387_v40, %v4156_v46  ;;  %v2325_v46 = vsel %vm1108_vm7, %v3905_v22, %v4170_v28  ;;  %v3221_v28 = vld [vmem:[%s4570_s2] ss:$0 sm:$0xff] }
 0x241   : > { %2174 = vrot.lane.b32.xlu1 %v1931_v60, %s3238_s10  ;;  %v2452_v56 = vsel %vm2444_vm0, %v2419_v35, %v4133_v63  ;;  %v2357_v22 = vsel %vm1174_vm9, %v2325_v46, %v4144_v42 }
 0x242   : > { %v1589_v61 = vmax.f32 %v1537_v51, 0.0  ;;  %v2227_v49 = vpop.permute.xlu1 %2226  ;;  %v1609_v31 = vpack.c.bf16 %v1591_v57, %v1590_v53  ;;  %v2117_v58 = vpop.permute.xlu0 %2116 }
 0x243   : > { %v2485_v39 = vsel %vm2477_vm1, %v2452_v56, %v2227_v49 }
 0x244   : > { %v1608_v11 = vpack.c.bf16 %v1589_v61, %v1588_v55  ;;  %2240 = vrot.lane.b32.xlu0 %v4166_v41, %s3239_s15  ;;  %v1704_v26 = vshrl.u32 %v1609_v31, 16  ;;  %v1707_v45 = vshll.u32 %v1609_v31, 16 }
 0x245   : > { %2210 = vrot.lane.b32.xlu1 %v2065_v29, %s3240_s16 }
 0x246   : > { %v1697_v8 = vshrl.u32 %v1608_v11, 16  ;;  %v4222_v0 = vpop.permute.xlu1 %2198  ;;  %v4224_v37 = vpop.permute.xlu0 %2292  ;;  %v1700_v27 = vshll.u32 %v1608_v11, 16  ;;  %v1706_v52 = vrot.slane %v1704_v26, 7  ;;  %v2389_v11 = vsel %vm1240_vm11, %v2357_v22, %v2117_v58 }
 0x248   : > { %v1699_v30 = vrot.slane %v1697_v8, 7  ;;  %2272 = vrot.lane.b32.xlu0 %v1931_v60, %s3242_s20  ;;  %v1709_v51 = vor.u32 %v1707_v45, %v1706_v52  ;;  %v1785_v26 = vsel %vm3281_vm2, %v1706_v52, 0 }
 0x249   : > { %v1952_v45 = vshll.u32 %v1785_v26, 16 }
 0x24a   : > { %v1702_v24 = vor.u32 %v1700_v27, %v1699_v30  ;;  %v1784_v50 = vsel %vm3281_vm2, %v1699_v30, 0  ;;  %v4231_v23 = vpop.permute.xlu1 %2085  ;;  %v4233_v7 = vpop.permute.xlu0 %2087  ;;  %v4273_v63 = vsel %vm3281_vm2, 0, %v1709_v51 }
 0x24b   : > { %v2067_v25 = vrot.slane %v1784_v50, 1  ;;  %v1940_v54 = vshll.u32 %v1784_v50, 16  ;;  %v1947_v27 = vshll.u32 %v4273_v63, 16 }
 0x24c   : > { %2304 = vrot.lane.b32.xlu0 %v2065_v29, %s3241_s17  ;;  %v4240_v32 = vsel %vm3281_vm2, 0, %v1702_v24 }
 0x24d   : > { %2242 = vrot.lane.b32.xlu1 %v4240_v32, %s3239_s15  ;;  %v2066_v44 = vrot.slane %v4240_v32, 1  ;;  %v1935_v12 = vshll.u32 %v4240_v32, 16  ;;  %v1933_v17 = vshrl.u32 %v4240_v32, 16  ;;  %v1942_v43 = vrot.slane %v1940_v54, 1 }
 0x24e   : > { %v4246_v34 = vpop.permute.xlu1 %2162  ;;  %v2291_v21 = vpop.permute.xlu0 %2290 }
 0x24f   : > { %v2068_v36 = vsel %vm785_vm3, %v2066_v44, %v2067_v25  ;;  %v1937_v5 = vrot.slane %v1935_v12, 1 }
 0x250   : > { %2306 = vrot.lane.b32.xlu0 %v2068_v36, %s3241_s17 }
 0x251   : > { %v1938_v9 = vor.u32 %v1937_v5, %v1933_v17  ;;  %v1949_v5 = vrot.slane %v1947_v27, 1 }
 0x252   : > { %v4255_v38 = vpop.permute.xlu1 %1980  ;;  %v2197_v48 = vpop.permute.xlu0 %2196 }
 0x253   : > { %v1943_v13 = vsel %vm528_vm4, %v1938_v9, %v1942_v43 }
 0x254   : > { %2274 = vrot.lane.b32.xlu1 %v1943_v13, %s3242_s20  ;;  %2099 = vrot.lane.b32.xlu0 %v2065_v29, %s3236_s8 }
 0x256   : > { %v2259_v53 = vpop.permute.xlu1 %2258  ;;  %v2261_v55 = vpop.permute.xlu0 %2260 }
 0x257   : > { %v2518_v57 = vsel %vm2510_vm5, %v2485_v39, %v2259_v53  ;;  %v1954_v39 = vrot.slane %v1952_v45, 1 }
 0x258   : > { %1992 = vrot.lane.b32.xlu1 %v1931_v60, %s3231_s24  ;;  %2132 = vrot.lane.b32.xlu0 %v4240_v32, %s3234_s29  ;;  %v2551_v61 = vsel %vm2543_vm6, %v2518_v57, %v2291_v21 }
 0x259   : > { %v3130_v49 = vpop.f32.mrb[28].mxu0  ;;  %3147 = vmatmul.mubr.msk.bf16.gmra.mrb[4].mxu1 %vm2619_vm8, %v2551_v61 }
 0x25a   : > { %v1558_v60 = vadd.f32 %v3221_v28, %v3130_v49  ;;  %v1979_v59 = vpop.permute.xlu1 %1978  ;;  %v1549_v31 = vpop.f32.mrb[29].mxu0  ;;  %v2070_v49 = vrot.slane %v1785_v26, 1 }
 0x25b   : > { %v1550_v29 = vadd.f32 %v3221_v28, %v1549_v31  ;;  %v2161_v8 = vpop.permute.xlu0 %2160  ;;  %v3131_v30 = vpop.f32.mrb[30].mxu0  ;;  %v2327_v61 = vsel %vm1108_vm7, %v3970_v19, %v1979_v59 }
 0x25c   : > { %v2421_v20 = vsel %vm1306_vm13, %v2389_v11, %v2161_v8  ;;  %v1561_v24 = vadd.f32 %v3221_v28, %v3131_v30  ;;  %1994 = vrot.lane.b32.xlu1 %v1943_v13, %s3231_s24  ;;  %v1552_v42 = vpop.f32.mrb[31].mxu0  ;;  %2176 = vrot.lane.b32.xlu0 %v1943_v13, %s3238_s10  ;;  %v1594_v58 = vmax.f32 %v1558_v60, 0.0  ;;  %v2359_v19 = vsel %vm1174_vm9, %v2327_v61, %v4231_v23 }
 0x25d   : > { %v2454_v50 = vsel %vm2444_vm0, %v2421_v20, %v2197_v48  ;;  %v1553_v14 = vadd.f32 %v3221_v28, %v1552_v42  ;;  %v1592_v54 = vmax.f32 %v1550_v29, 0.0 }
 0x25e   : > { %v2487_v44 = vsel %vm2477_vm1, %v2454_v50, %v4207_v1  ;;  %v1595_v25 = vmax.f32 %v1561_v24, 0.0  ;;  %v4291_v12 = vpop.permute.xlu1 %2122  ;;  %v1945_v1 = vshrl.u32 %v4273_v63, 16  ;;  %v2391_v50 = vsel %vm1240_vm11, %v2359_v19, %v4204_v33 }
 0x25f   : > { %v1593_v40 = vmax.f32 %v1553_v14, 0.0  ;;  %v4293_v21 = vpop.permute.xlu0 %2232  ;;  %v2520_v17 = vsel %vm2510_vm5, %v2487_v44, %v2261_v55  ;;  %v2069_v55 = vrot.slane %v4273_v63, 1 }
 0x260   : > { %v1611_v9 = vpack.c.bf16 %v1595_v25, %v1594_v58  ;;  %2101 = vrot.lane.b32.xlu1 %v2068_v36, %s3236_s8  ;;  %2212 = vrot.lane.b32.xlu0 %v2068_v36, %s3240_s16  ;;  %v2553_v52 = vsel %vm2543_vm6, %v2520_v17, %v4224_v37  ;;  %v1950_v51 = vor.u32 %v1949_v5, %v1945_v1 }
 0x261   : > { %v1610_v43 = vpack.c.bf16 %v1593_v40, %v1592_v54  ;;  %3150 = vmatprep.mubr.msk.bf16.mxu1 %vm2619_vm8, %v2553_v52  ;;  %v2071_v29 = vsel %vm785_vm3, %v2069_v55, %v2070_v49  ;;  %v2423_v54 = vsel %vm1306_vm13, %v2391_v50, %v4246_v34  ;;  %v2329_v34 = vsel %vm1108_vm7, %v3960_v15, %v4255_v38 }
 0x262   : > { %v2231_v35 = vpop.permute.xlu1 %2230  ;;  %v1955_v57 = vsel %vm528_vm4, %v1950_v51, %v1954_v39  ;;  %v1718_v59 = vshrl.u32 %v1611_v9, 16  ;;  %v1721_v25 = vshll.u32 %v1611_v9, 16  ;;  %v2456_v52 = vsel %vm2444_vm0, %v2423_v54, %v4222_v0 }
 0x263   : > { %v1711_v48 = vshrl.u32 %v1610_v43, 16  ;;  %v2121_v13 = vpop.permute.xlu0 %2120  ;;  %v1714_v56 = vshll.u32 %v1610_v43, 16  ;;  %v2489_v43 = vsel %vm2477_vm1, %v2456_v52, %v2231_v35  ;;  %v2361_v35 = vsel %vm1174_vm9, %v2329_v34, %v4233_v7 }
 0x264   : > { %2134 = vrot.lane.b32.xlu1 %v4273_v63, %s3234_s29  ;;  %2244 = vrot.lane.b32.xlu0 %v4273_v63, %s3239_s15  ;;  %v1720_v23 = vrot.slane %v1718_v59, 7  ;;  %v2393_v15 = vsel %vm1240_vm11, %v2361_v35, %v2121_v13 }
 0x265   : > { %v1713_v36 = vrot.slane %v1711_v48, 7 }
 0x266   : > { %v4306_v37 = vpop.permute.xlu1 %2202  ;;  %v1723_v5 = vor.u32 %v1721_v25, %v1720_v23 }
 0x267   : > { %v1716_v53 = vor.u32 %v1714_v56, %v1713_v36  ;;  %v4308_v46 = vpop.permute.xlu0 %2296  ;;  %v1786_v28 = vsel %vm3281_vm2, %v1713_v36, 0 }
 0x268   : > { %2178 = vrot.lane.b32.xlu1 %v1955_v57, %s3238_s10  ;;  %2276 = vrot.lane.b32.xlu0 %v1955_v57, %s3242_s20  ;;  %v2073_v27 = vrot.slane %v1786_v28, 1  ;;  %v1964_v24 = vshll.u32 %v1786_v28, 16  ;;  %v1771_v0 = vsel %vm3281_vm2, 0, %v1723_v5 }
 0x269   : > { %v4318_v22 = vsel %vm3281_vm2, 0, %v1716_v53  ;;  %v2143_v36 = vshll.u32 %v1771_v0, 16  ;;  %v1787_v53 = vsel %vm3281_vm2, %v1720_v23, 0  ;;  %v2141_v28 = vshrl.u32 %v1771_v0, 16 }
 0x26a   : > { %v4322_v60 = vpop.permute.xlu1 %2089  ;;  %v1959_v31 = vshll.u32 %v4318_v22, 16  ;;  %v2072_v8 = vrot.slane %v4318_v22, 1  ;;  %v1957_v20 = vshrl.u32 %v4318_v22, 16  ;;  %v1966_v44 = vrot.slane %v1964_v24, 1 }
 0x26b   : > { %v4325_v11 = vpop.permute.xlu0 %2091  ;;  %v2145_v61 = vrot.slane %v2143_v36, 1  ;;  %v2148_v2 = vshll.u32 %v1787_v53, 16 }
 0x26c   : > { %2214 = vrot.lane.b32.xlu1 %v2071_v29, %s3240_s16  ;;  %2308 = vrot.lane.b32.xlu0 %v2071_v29, %s3241_s17  ;;  %v1961_v30 = vrot.slane %v1959_v31, 1  ;;  %v2074_v26 = vsel %vm785_vm3, %v2072_v8, %v2073_v27  ;;  %v2185_v27 = vrot.slane %v1771_v0, 1 }
 0x26d   : > { %v2146_v8 = vor.u32 %v2145_v61, %v2141_v28 }
 0x26e   : > { %v4334_v42 = vpop.permute.xlu1 %2166  ;;  %v1962_v58 = vor.u32 %v1961_v30, %v1957_v20  ;;  %v2186_v20 = vrot.slane %v1787_v53, 1 }
 0x26f   : > { %v2295_v14 = vpop.permute.xlu0 %2294 }
 0x270   : > { %2246 = vrot.lane.b32.xlu1 %v4318_v22, %s3239_s15  ;;  %2310 = vrot.lane.b32.xlu0 %v2074_v26, %s3241_s17  ;;  %v1967_v33 = vsel %vm528_vm4, %v1962_v58, %v1966_v44 }
 0x272   : > { %v4344_v40 = vpop.permute.xlu1 %1984 }
 0x273   : > { %v2201_v17 = vpop.permute.xlu0 %2200 }
 0x274   : > { %2278 = vrot.lane.b32.xlu1 %v1967_v33, %s3242_s20  ;;  %2103 = vrot.lane.b32.xlu0 %v2071_v29, %s3236_s8 }
 0x276   : > { %v2263_v1 = vpop.permute.xlu1 %2262 }
 0x277   : > { %v2522_v9 = vsel %vm2510_vm5, %v2489_v43, %v2263_v1  ;;  %v2265_v45 = vpop.permute.xlu0 %2264 }
 0x278   : > { %1996 = vrot.lane.b32.xlu1 %v1955_v57, %s3231_s24  ;;  %2136 = vrot.lane.b32.xlu0 %v4318_v22, %s3234_s29  ;;  %v2555_v48 = vsel %vm2543_vm6, %v2522_v9, %v2295_v14  ;;  %v2187_v14 = vsel %vm785_vm3, %v2185_v27, %v2186_v20 }
 0x279   : > { %3151 = vmatmul.mubr.msk.bf16.gmra.mrb[8].mxu1 %vm2619_vm8, %v2555_v48 }
 0x27a   : > { %v1983_v51 = vpop.permute.xlu1 %1982 }
 0x27b   : > { %v2165_v38 = vpop.permute.xlu0 %2164 }
 0x27c   : > { %v2425_v56 = vsel %vm1306_vm13, %v2393_v15, %v2165_v38  ;;  %1998 = vrot.lane.b32.xlu1 %v1967_v33, %s3231_s24  ;;  %2180 = vrot.lane.b32.xlu0 %v1967_v33, %s3238_s10 }
 0x27d   : > { %v2458_v39 = vsel %vm2444_vm0, %v2425_v56, %v2201_v17 }
 0x27e   : > { %v2491_v57 = vsel %vm2477_vm1, %v2458_v39, %v4293_v21  ;;  %v2127_v7 = vpop.permute.xlu1 %2126  ;;  %v2150_v21 = vrot.slane %v2148_v2, 1 }
 0x27f   : > { %v2237_v55 = vpop.permute.xlu0 %2236  ;;  %v2524_v13 = vsel %vm2510_vm5, %v2491_v57, %v2265_v45 }
 0x280   : > { %2105 = vrot.lane.b32.xlu1 %v2074_v26, %s3236_s8  ;;  %2216 = vrot.lane.b32.xlu0 %v2074_v26, %s3240_s16  ;;  %v2557_v49 = vsel %vm2543_vm6, %v2524_v13, %v4308_v46  ;;  %v2151_v30 = vsel %vm528_vm4, %v2146_v8, %v2150_v21  ;;  %v2331_v46 = vsel %vm1108_vm7, %v4016_v4, %v1983_v51  ;;  %s3053_s8 = sshll.u32 %s4577_s19, 6 }
 0x281   : > { %3154 = vmatprep.mubr.msk.bf16.mxu1 %vm2619_vm8, %v2557_v49  ;;  %v2363_v26 = vsel %vm1174_vm9, %v2331_v46, %v4322_v60  ;;  %v2333_v60 = vsel %vm1108_vm7, %v4006_v62, %v4344_v40  ;;  %s4505_s13 = scalar_lea.vmem %s4573_s5, %s3053_s8 }
 0x282   : > { %v2235_v31 = vpop.permute.xlu1 %2234  ;;  %v2395_v23 = vsel %vm1240_vm11, %v2363_v26, %v4291_v12 }
 0x283   : > { %v2125_v29 = vpop.permute.xlu0 %2124  ;;  %v2427_v4 = vsel %vm1306_vm13, %v2395_v23, %v4334_v42 }
 0x284   : > { %2138 = vrot.lane.b32.xlu1 %v1771_v0, %s3234_s29  ;;  %2248 = vrot.lane.b32.xlu0 %v1771_v0, %s3239_s15  ;;  %v2460_v17 = vsel %vm2444_vm0, %v2427_v4, %v4306_v37 }
 0x285   : > { %v2493_v12 = vsel %vm2477_vm1, %v2460_v17, %v2235_v31 }
 0x286   : > { %v2207_v19 = vpop.permute.xlu1 %2206 }
 0x287   : > { %v2301_v59 = vpop.permute.xlu0 %2300 }
 0x288   : > { %2182 = vrot.lane.b32.xlu1 %v2151_v30, %s3238_s10  ;;  %2280 = vrot.lane.b32.xlu0 %v2151_v30, %s3242_s20 }
 0x28a   : > { %v2094_v24 = vpop.permute.xlu1 %2093 }
 0x28b   : > { %v2299_v50 = vpop.permute.xlu0 %2298 }
 0x28c   : > { %2218 = vrot.lane.b32.xlu1 %v2187_v14, %s3240_s16  ;;  %2312 = vrot.lane.b32.xlu0 %v2187_v14, %s3241_s17 }
 0x28e   : > { %v2171_v58 = vpop.permute.xlu1 %2170 }
 0x28f   : > { %v2205_v44 = vpop.permute.xlu0 %2204 }
 0x290   : > { %2250 = vrot.lane.b32.xlu1 %v3287_v3, %s3239_s15  ;;  %v2365_v3 = vsel %vm1174_vm9, %v2333_v60, %v4325_v11 }
 0x291   : > { %v2397_v42 = vsel %vm1240_vm11, %v2365_v3, %v2125_v29 }
 0x292   : > { %v1989_v25 = vpop.permute.xlu1 %1988 }
 0x293   : > { %v2269_v54 = vpop.permute.xlu0 %2268  ;;  %v2337_v61 = vsel %vm1108_vm7, %v4066_v6, %v1989_v25 }
 0x294   : > { %2282 = vrot.lane.b32.xlu1 %v3310_v18, %s3242_s20 }
 0x296   : > { %v2267_v33 = vpop.permute.xlu1 %2266 }
 0x297   : > { %v2526_v5 = vsel %vm2510_vm5, %v2493_v12, %v2267_v33  ;;  %v2169_v52 = vpop.permute.xlu0 %2168 }
 0x298   : > { %v2429_v62 = vsel %vm1306_vm13, %v2397_v42, %v2169_v52  ;;  %2314 = vrot.lane.b32.xlu1 %v3298_v10, %s3241_s17  ;;  %v2559_v18 = vsel %vm2543_vm6, %v2526_v5, %v2299_v50 }
 0x299   : > { %v2462_v37 = vsel %vm2444_vm0, %v2429_v62, %v2205_v44  ;;  %3155 = vmatmul.mubr.msk.bf16.gmra.mrb[12].mxu1 %vm2619_vm8, %v2559_v18 }
 0x29a   : > { %v2495_v40 = vsel %vm2477_vm1, %v2462_v37, %v2237_v55  ;;  %v1987_v11 = vpop.permute.xlu1 %1986 }
 0x29b   : > { %v2335_v43 = vsel %vm1108_vm7, %v4078_v16, %v1987_v11  ;;  %v2528_v1 = vsel %vm2510_vm5, %v2495_v40, %v2269_v54 }
 0x29c   : > { %v2367_v34 = vsel %vm1174_vm9, %v2335_v43, %v2094_v24  ;;  %v2561_v9 = vsel %vm2543_vm6, %v2528_v1, %v2301_v59 }
 0x29d   : > { %3158 = vmatprep.mubr.msk.bf16.mxu1 %vm2619_vm8, %v2561_v9  ;;  %v2399_v10 = vsel %vm1240_vm11, %v2367_v34, %v2127_v7 }
 0x29e   : > { %v2431_v48 = vsel %vm1306_vm13, %v2399_v10, %v2171_v58 }
 0x29f   : > { %v2239_v45 = vpop.permute.xlu1 %2238  ;;  %v2464_v51 = vsel %vm2444_vm0, %v2431_v48, %v2207_v19 }
 0x2a0   : > { %v2497_v16 = vsel %vm2477_vm1, %v2464_v51, %v2239_v45 }
 0x2a2   : > { %v2303_v0 = vpop.permute.xlu0 %2302 }
 0x2a3   : > { %v2098_v35 = vpop.permute.xlu1 %2097 }
 0x2a6   : > { %v2096_v15 = vpop.permute.xlu0 %2095 }
 0x2a7   : > { %v2271_v38 = vpop.permute.xlu1 %2270  ;;  %v2369_v28 = vsel %vm1174_vm9, %v2337_v61, %v2096_v15 }
 0x2a8   : > { %v2530_v36 = vsel %vm2510_vm5, %v2497_v16, %v2271_v38 }
 0x2a9   : > { %v2563_v56 = vsel %vm2543_vm6, %v2530_v36, %v2303_v0 }
 0x2aa   : > { %3159 = vmatmul.mubr.msk.bf16.gmra.mrb[16].mxu1 %vm2619_vm8, %v2563_v56  ;;  %v2129_v39 = vpop.permute.xlu0 %2128 }
 0x2ab   : > { %v1991_v53 = vpop.permute.xlu1 %1990  ;;  %v2401_v2 = vsel %vm1240_vm11, %v2369_v28, %v2129_v39 }
 0x2ac   : > { %v2339_v27 = vsel %vm1108_vm7, %v4150_v47, %v1991_v53 }
 0x2ad   : > { %v2371_v46 = vsel %vm1174_vm9, %v2339_v27, %v2098_v35 }
 0x2ae   : > { %v2173_v57 = vpop.permute.xlu0 %2172 }
 0x2af   : > { %v2131_v7 = vpop.permute.xlu1 %2130  ;;  %v2433_v29 = vsel %vm1306_vm13, %v2401_v2, %v2173_v57 }
 0x2b0   : > { %v2403_v50 = vsel %vm1240_vm11, %v2371_v46, %v2131_v7 }
 0x2b2   : > { %v2209_v55 = vpop.permute.xlu0 %2208 }
 0x2b3   : > { %v2175_v49 = vpop.permute.xlu1 %2174  ;;  %v2466_v8 = vsel %vm2444_vm0, %v2433_v29, %v2209_v55 }
 0x2b4   : > { %v2435_v14 = vsel %vm1306_vm13, %v2403_v50, %v2175_v49 }
 0x2b6   : > { %v2241_v13 = vpop.permute.xlu0 %2240 }
 0x2b7   : > { %v2499_v21 = vsel %vm2477_vm1, %v2466_v8, %v2241_v13  ;;  %v2211_v19 = vpop.permute.xlu1 %2210 }
 0x2b8   : > { %v2468_v26 = vsel %vm2444_vm0, %v2435_v14, %v2211_v19 }
 0x2ba   : > { %v2273_v31 = vpop.permute.xlu0 %2272 }
 0x2bb   : > { %v2532_v59 = vsel %vm2510_vm5, %v2499_v21, %v2273_v31 }
 0x2be   : > { %v2305_v30 = vpop.permute.xlu0 %2304 }
 0x2bf   : > { %v2565_v6 = vsel %vm2543_vm6, %v2532_v59, %v2305_v30  ;;  %v2243_v20 = vpop.permute.xlu1 %2242 }
 0x2c0   : > { %3162 = vmatprep.mubr.msk.bf16.mxu1 %vm2619_vm8, %v2565_v6  ;;  %v2501_v58 = vsel %vm2477_vm1, %v2468_v26, %v2243_v20 }
 0x2c2   : > { %v2307_v24 = vpop.permute.xlu0 %2306 }
 0x2c6   : > { %v2275_v23 = vpop.permute.xlu1 %2274  ;;  %v2100_v44 = vpop.permute.xlu0 %2099 }
 0x2c7   : > { %v2534_v47 = vsel %vm2510_vm5, %v2501_v58, %v2275_v23 }
 0x2c8   : > { %v2567_v4 = vsel %vm2543_vm6, %v2534_v47, %v2307_v24 }
 0x2c9   : > { %3163 = vmatmul.mubr.msk.bf16.gmra.mrb[20].mxu1 %vm2619_vm8, %v2567_v4  ;;  %v4491_v4 = vld [vmem:[%s4572_s4] ss:$0 sm:$0xff] }
 0x2ca   : > { %v1993_v25 = vpop.permute.xlu1 %1992  ;;  %v2133_v60 = vpop.permute.xlu0 %2132 }
 0x2cb   : > { %v2341_v12 = vsel %vm1108_vm7, %v4166_v41, %v1993_v25 }
 0x2cc   : > { %v2373_v42 = vsel %vm1174_vm9, %v2341_v12, %v2100_v44 }
 0x2cd   : > { %v2405_v62 = vsel %vm1240_vm11, %v2373_v42, %v2133_v60 }
 0x2ce   : > { %v1995_v54 = vpop.permute.xlu1 %1994  ;;  %v2177_v17 = vpop.permute.xlu0 %2176 }
 0x2cf   : > { %v2437_v40 = vsel %vm1306_vm13, %v2405_v62, %v2177_v17  ;;  %v2343_v10 = vsel %vm1108_vm7, %v4240_v32, %v1995_v54 }
 0x2d2   : > { %v2102_v3 = vpop.permute.xlu1 %2101  ;;  %v2213_v33 = vpop.permute.xlu0 %2212 }
 0x2d3   : > { %v2470_v11 = vsel %vm2444_vm0, %v2437_v40, %v2213_v33  ;;  %v2375_v45 = vsel %vm1174_vm9, %v2343_v10, %v2102_v3 }
 0x2d6   : > { %v2135_v5 = vpop.permute.xlu1 %2134  ;;  %v2245_v52 = vpop.permute.xlu0 %2244 }
 0x2d7   : > { %v2503_v43 = vsel %vm2477_vm1, %v2470_v11, %v2245_v52  ;;  %v2407_v35 = vsel %vm1240_vm11, %v2375_v45, %v2135_v5 }
 0x2da   : > { %v2179_v18 = vpop.permute.xlu1 %2178  ;;  %v2277_v37 = vpop.permute.xlu0 %2276 }
 0x2db   : > { %v2536_v1 = vsel %vm2510_vm5, %v2503_v43, %v2277_v37  ;;  %v2439_v51 = vsel %vm1306_vm13, %v2407_v35, %v2179_v18 }
 0x2de   : > { %v2215_v34 = vpop.permute.xlu1 %2214  ;;  %v2309_v41 = vpop.permute.xlu0 %2308 }
 0x2df   : > { %v2569_v9 = vsel %vm2543_vm6, %v2536_v1, %v2309_v41  ;;  %v2472_v15 = vsel %vm2444_vm0, %v2439_v51, %v2215_v34 }
 0x2e0   : > { %3166 = vmatprep.mubr.msk.bf16.mxu1 %vm2619_vm8, %v2569_v9 }
 0x2e2   : > { %v2247_v48 = vpop.permute.xlu1 %2246  ;;  %v2311_v0 = vpop.permute.xlu0 %2310 }
 0x2e3   : > { %v2505_v16 = vsel %vm2477_vm1, %v2472_v15, %v2247_v48 }
 0x2e6   : > { %v2279_v38 = vpop.permute.xlu1 %2278  ;;  %v2104_v36 = vpop.permute.xlu0 %2103 }
 0x2e7   : > { %v2538_v56 = vsel %vm2510_vm5, %v2505_v16, %v2279_v38 }
 0x2e8   : > { %v2571_v39 = vsel %vm2543_vm6, %v2538_v56, %v2311_v0 }
 0x2e9   : > { %3167 = vmatmul.mubr.msk.bf16.gmra.mrb[24].mxu1 %vm2619_vm8, %v2571_v39 }
 0x2ea   : > { %v1997_v32 = vpop.permute.xlu1 %1996  ;;  %v2137_v53 = vpop.permute.xlu0 %2136 }
 0x2eb   : > { %v2345_v55 = vsel %vm1108_vm7, %v4273_v63, %v1997_v32 }
 0x2ec   : > { %v2377_v49 = vsel %vm1174_vm9, %v2345_v55, %v2104_v36 }
 0x2ed   : > { %v2409_v31 = vsel %vm1240_vm11, %v2377_v49, %v2137_v53 }
 0x2ee   : > { %v1999_v57 = vpop.permute.xlu1 %1998  ;;  %v2181_v7 = vpop.permute.xlu0 %2180 }
 0x2ef   : > { %v2441_v21 = vsel %vm1306_vm13, %v2409_v31, %v2181_v7  ;;  %v2347_v20 = vsel %vm1108_vm7, %v4318_v22, %v1999_v57 }
 0x2f2   : > { %v2106_v13 = vpop.permute.xlu1 %2105  ;;  %v2217_v61 = vpop.permute.xlu0 %2216 }
 0x2f3   : > { %v2474_v19 = vsel %vm2444_vm0, %v2441_v21, %v2217_v61  ;;  %v2379_v24 = vsel %vm1174_vm9, %v2347_v20, %v2106_v13 }
 0x2f6   : > { %v2139_v28 = vpop.permute.xlu1 %2138  ;;  %v2249_v2 = vpop.permute.xlu0 %2248 }
 0x2f7   : > { %v2507_v59 = vsel %vm2477_vm1, %v2474_v19, %v2249_v2  ;;  %v2411_v50 = vsel %vm1240_vm11, %v2379_v24, %v2139_v28 }
 0x2fa   : > { %v2183_v29 = vpop.permute.xlu1 %2182  ;;  %v2281_v8 = vpop.permute.xlu0 %2280 }
 0x2fb   : > { %v2540_v30 = vsel %vm2510_vm5, %v2507_v59, %v2281_v8  ;;  %v2443_v26 = vsel %vm1306_vm13, %v2411_v50, %v2183_v29 }
 0x2fe   : > { %v2219_v27 = vpop.permute.xlu1 %2218  ;;  %v2313_v63 = vpop.permute.xlu0 %2312 }
 0x2ff   : > { %v2573_v6 = vsel %vm2543_vm6, %v2540_v30, %v2313_v63  ;;  %v2476_v58 = vsel %vm2444_vm0, %v2443_v26, %v2219_v27 }
 0x300   : > { %3170 = vmatprep.mubr.msk.bf16.mxu1 %vm2619_vm8, %v2573_v6 }
 0x302   : > { %v2251_v46 = vpop.permute.xlu1 %2250 }
 0x303   : > { %v2509_v23 = vsel %vm2477_vm1, %v2476_v58, %v2251_v46 }
 0x306   : > { %v2283_v14 = vpop.permute.xlu1 %2282 }
 0x307   : > { %v2542_v44 = vsel %vm2510_vm5, %v2509_v23, %v2283_v14 }
 0x30a   : > { %v2315_v47 = vpop.permute.xlu1 %2314 }
 0x30b   : > { %v2575_v22 = vsel %vm2543_vm6, %v2542_v44, %v2315_v47 }
 0x30c   : > { %v3144_v25 = vpop.f32.mrb[0].mxu1  ;;  %3171 = vmatmul.mubr.msk.bf16.gmra.mrb[28].mxu1 %vm2619_vm8, %v2575_v22 }
 0x30d   : > { %v2699_v60 = vadd.f32 %v3144_v25, %v4491_v4  ;;  %v2690_v54 = vpop.f32.mrb[1].mxu1 }
 0x30e   : > { %v2691_v17 = vadd.f32 %v4491_v4, %v2690_v54  ;;  %v3145_v12 = vpop.f32.mrb[2].mxu1 }
 0x30f   : > { %v2819_v3 = vmax.f32 %v2699_v60, 0.0  ;;  %v2702_v33 = vadd.f32 %v3145_v12, %v4491_v4  ;;  %v2693_v42 = vpop.f32.mrb[3].mxu1 }
 0x310   : > { %v2817_v5 = vmax.f32 %v2691_v17, 0.0  ;;  %v2694_v52 = vadd.f32 %v4491_v4, %v2693_v42 }
 0x311   : > { %v2820_v62 = vmax.f32 %v2702_v33, 0.0 }
 0x312   : > { %v2849_v18 = vmax.f32 %v2817_v5, %v2819_v3  ;;  %v2818_v37 = vmax.f32 %v2694_v52, 0.0 }
 0x314   : > { %2865 = vst.msk [vmem:[#allocation2] sm:$0xff] %vm1108_vm7, %v2849_v18  ;;  %v2850_v40 = vmax.f32 %v2818_v37, %v2820_v62 }
 0x316   : > { %2866 = vst.msk [vmem:[#allocation2 + $0x8] sm:$0xff] %vm1108_vm7, %v2850_v40 }
 0x31d   : > { %v2881_v11 = vld [vmem:[#allocation2] ss:$2 sm:$0xff]  ;;  %v2897_v43 = vld [vmem:[#allocation2 + $0x1] ss:$2 sm:$0xff] }
 0x31e   : > { %v2912_v1 = vmax.f32 %v2881_v11, %v2897_v43 }
 0x320   : > { %2920 = vst.msk [vmem:[%s4505_s13] sm:$0xff] %vm1108_vm7, %v2912_v1 }
 0x32c   : > { %v3148_v34 = vpop.f32.mrb[4].mxu1 }
 0x32d   : > { %v2715_v41 = vadd.f32 %v3148_v34, %v4491_v4  ;;  %v2706_v9 = vpop.f32.mrb[5].mxu1 }
 0x32e   : > { %v2707_v10 = vadd.f32 %v4491_v4, %v2706_v9  ;;  %v3149_v45 = vpop.f32.mrb[6].mxu1 }
 0x32f   : > { %v2823_v48 = vmax.f32 %v2715_v41, 0.0  ;;  %v2718_v0 = vadd.f32 %v3149_v45, %v4491_v4  ;;  %v2709_v35 = vpop.f32.mrb[7].mxu1 }
 0x330   : > { %v2821_v51 = vmax.f32 %v2707_v10, 0.0  ;;  %v2710_v15 = vadd.f32 %v4491_v4, %v2709_v35 }
 0x331   : > { %v2824_v16 = vmax.f32 %v2718_v0, 0.0 }
 0x332   : > { %v2851_v38 = vmax.f32 %v2821_v51, %v2823_v48  ;;  %v2822_v36 = vmax.f32 %v2710_v15, 0.0 }
 0x334   : > { %2867 = vst.msk [vmem:[#allocation2 + $0x10] sm:$0xff] %vm1108_vm7, %v2851_v38  ;;  %v2852_v56 = vmax.f32 %v2822_v36, %v2824_v16 }
 0x336   : > { %2868 = vst.msk [vmem:[#allocation2 + $0x18] sm:$0xff] %vm1108_vm7, %v2852_v56 }
 0x33d   : > { %v2883_v39 = vld [vmem:[#allocation2 + $0x10] ss:$2 sm:$0xff]  ;;  %v2899_v32 = vld [vmem:[#allocation2 + $0x11] ss:$2 sm:$0xff] }
 0x33e   : > { %v2913_v53 = vmax.f32 %v2883_v39, %v2899_v32 }
 0x340   : > { %2921 = vst.msk [vmem:[%s4505_s13 + $0x8] sm:$0xff] %vm1108_vm7, %v2913_v53 }
 0x34c   : > { %v3152_v57 = vpop.f32.mrb[8].mxu1 }
 0x34d   : > { %v2731_v7 = vadd.f32 %v3152_v57, %v4491_v4  ;;  %v2722_v55 = vpop.f32.mrb[9].mxu1 }
 0x34e   : > { %v2723_v13 = vadd.f32 %v4491_v4, %v2722_v55  ;;  %v3153_v61 = vpop.f32.mrb[10].mxu1 }
 0x34f   : > { %v2827_v49 = vmax.f32 %v2731_v7, 0.0  ;;  %v2734_v28 = vadd.f32 %v3153_v61, %v4491_v4  ;;  %v2725_v2 = vpop.f32.mrb[11].mxu1 }
 0x350   : > { %v2825_v31 = vmax.f32 %v2723_v13, 0.0  ;;  %v2726_v29 = vadd.f32 %v4491_v4, %v2725_v2 }
 0x351   : > { %v2828_v8 = vmax.f32 %v2734_v28, 0.0 }
 0x352   : > { %v2853_v21 = vmax.f32 %v2825_v31, %v2827_v49  ;;  %v2826_v19 = vmax.f32 %v2726_v29, 0.0 }
 0x354   : > { %2869 = vst.msk [vmem:[#allocation2 + $0x20] sm:$0xff] %vm1108_vm7, %v2853_v21  ;;  %v2854_v59 = vmax.f32 %v2826_v19, %v2828_v8 }
 0x356   : > { %2870 = vst.msk [vmem:[#allocation2 + $0x28] sm:$0xff] %vm1108_vm7, %v2854_v59 }
 0x35d   : > { %v2885_v30 = vld [vmem:[#allocation2 + $0x20] ss:$2 sm:$0xff]  ;;  %v2901_v27 = vld [vmem:[#allocation2 + $0x21] ss:$2 sm:$0xff] }
 0x35e   : > { %v2914_v63 = vmax.f32 %v2885_v30, %v2901_v27 }
 0x360   : > { %2922 = vst.msk [vmem:[%s4505_s13 + $0x10] sm:$0xff] %vm1108_vm7, %v2914_v63 }
 0x36c   : > { %v3156_v6 = vpop.f32.mrb[12].mxu1 }
 0x36d   : > { %v2747_v46 = vadd.f32 %v3156_v6, %v4491_v4  ;;  %v2738_v20 = vpop.f32.mrb[13].mxu1 }
 0x36e   : > { %v2739_v24 = vadd.f32 %v4491_v4, %v2738_v20  ;;  %v3157_v50 = vpop.f32.mrb[14].mxu1 }
 0x36f   : > { %v2831_v14 = vmax.f32 %v2747_v46, 0.0  ;;  %v2750_v26 = vadd.f32 %v3157_v50, %v4491_v4  ;;  %v2741_v58 = vpop.f32.mrb[15].mxu1 }
 0x370   : > { %v2829_v23 = vmax.f32 %v2739_v24, 0.0  ;;  %v2742_v44 = vadd.f32 %v4491_v4, %v2741_v58 }
 0x371   : > { %v2832_v47 = vmax.f32 %v2750_v26, 0.0 }
 0x372   : > { %v2855_v22 = vmax.f32 %v2829_v23, %v2831_v14  ;;  %v2830_v25 = vmax.f32 %v2742_v44, 0.0 }
 0x374   : > { %2871 = vst.msk [vmem:[#allocation2 + $0x30] sm:$0xff] %vm1108_vm7, %v2855_v22  ;;  %v2856_v60 = vmax.f32 %v2830_v25, %v2832_v47 }
 0x376   : > { %2872 = vst.msk [vmem:[#allocation2 + $0x38] sm:$0xff] %vm1108_vm7, %v2856_v60 }
 0x37d   : > { %v2887_v54 = vld [vmem:[#allocation2 + $0x30] ss:$2 sm:$0xff]  ;;  %v2903_v17 = vld [vmem:[#allocation2 + $0x31] ss:$2 sm:$0xff]  ;;  %v3160_v12 = vpop.f32.mrb[16].mxu1 }
 0x37e   : > { %v2915_v3 = vmax.f32 %v2887_v54, %v2903_v17  ;;  %v2763_v33 = vadd.f32 %v3160_v12, %v4491_v4  ;;  %v2754_v42 = vpop.f32.mrb[17].mxu1 }
 0x37f   : > { %v2755_v5 = vadd.f32 %v4491_v4, %v2754_v42  ;;  %v3161_v52 = vpop.f32.mrb[18].mxu1 }
 0x380   : > { %2923 = vst.msk [vmem:[%s4505_s13 + $0x18] sm:$0xff] %vm1108_vm7, %v2915_v3  ;;  %v2835_v62 = vmax.f32 %v2763_v33, 0.0  ;;  %v2766_v18 = vadd.f32 %v3161_v52, %v4491_v4  ;;  %v2757_v37 = vpop.f32.mrb[19].mxu1 }
 0x381   : > { %v2833_v40 = vmax.f32 %v2755_v5, 0.0  ;;  %v2758_v11 = vadd.f32 %v4491_v4, %v2757_v37 }
 0x382   : > { %v2836_v43 = vmax.f32 %v2766_v18, 0.0 }
 0x383   : > { %v2857_v1 = vmax.f32 %v2833_v40, %v2835_v62  ;;  %v2834_v34 = vmax.f32 %v2758_v11, 0.0 }
 0x385   : > { %2873 = vst.msk [vmem:[#allocation2 + $0x40] sm:$0xff] %vm1108_vm7, %v2857_v1  ;;  %v2858_v41 = vmax.f32 %v2834_v34, %v2836_v43 }
 0x387   : > { %2874 = vst.msk [vmem:[#allocation2 + $0x48] sm:$0xff] %vm1108_vm7, %v2858_v41 }
 0x38e   : > { %v2889_v9 = vld [vmem:[#allocation2 + $0x40] ss:$2 sm:$0xff]  ;;  %v2905_v10 = vld [vmem:[#allocation2 + $0x41] ss:$2 sm:$0xff] }
 0x38f   : > { %v2916_v45 = vmax.f32 %v2889_v9, %v2905_v10 }
 0x391   : > { %2924 = vst.msk [vmem:[%s4505_s13 + $0x20] sm:$0xff] %vm1108_vm7, %v2916_v45 }
 0x39c   : > { %v3164_v48 = vpop.f32.mrb[20].mxu1 }
 0x39d   : > { %v2779_v0 = vadd.f32 %v3164_v48, %v4491_v4  ;;  %v2770_v35 = vpop.f32.mrb[21].mxu1 }
 0x39e   : > { %v2771_v51 = vadd.f32 %v4491_v4, %v2770_v35  ;;  %v3165_v15 = vpop.f32.mrb[22].mxu1 }
 0x39f   : > { %v2839_v16 = vmax.f32 %v2779_v0, 0.0  ;;  %v2782_v38 = vadd.f32 %v3165_v15, %v4491_v4  ;;  %v2773_v36 = vpop.f32.mrb[23].mxu1 }
 0x3a0   : > { %v2837_v56 = vmax.f32 %v2771_v51, 0.0  ;;  %v2774_v39 = vadd.f32 %v4491_v4, %v2773_v36 }
 0x3a1   : > { %v2840_v32 = vmax.f32 %v2782_v38, 0.0 }
 0x3a2   : > { %v2859_v53 = vmax.f32 %v2837_v56, %v2839_v16  ;;  %v2838_v57 = vmax.f32 %v2774_v39, 0.0 }
 0x3a4   : > { %2875 = vst.msk [vmem:[#allocation2 + $0x50] sm:$0xff] %vm1108_vm7, %v2859_v53  ;;  %v2860_v7 = vmax.f32 %v2838_v57, %v2840_v32 }
 0x3a6   : > { %2876 = vst.msk [vmem:[#allocation2 + $0x58] sm:$0xff] %vm1108_vm7, %v2860_v7 }
 0x3ad   : > { %v2891_v55 = vld [vmem:[#allocation2 + $0x50] ss:$2 sm:$0xff]  ;;  %v2907_v13 = vld [vmem:[#allocation2 + $0x51] ss:$2 sm:$0xff] }
 0x3ae   : > { %v2917_v61 = vmax.f32 %v2891_v55, %v2907_v13 }
 0x3b0   : > { %2925 = vst.msk [vmem:[%s4505_s13 + $0x28] sm:$0xff] %vm1108_vm7, %v2917_v61 }
 0x3bc   : > { %v3168_v49 = vpop.f32.mrb[24].mxu1 }
 0x3bd   : > { %v2795_v28 = vadd.f32 %v3168_v49, %v4491_v4  ;;  %v2786_v2 = vpop.f32.mrb[25].mxu1 }
 0x3be   : > { %v2787_v31 = vadd.f32 %v4491_v4, %v2786_v2  ;;  %v3169_v29 = vpop.f32.mrb[26].mxu1 }
 0x3bf   : > { %v2843_v8 = vmax.f32 %v2795_v28, 0.0  ;;  %v2798_v21 = vadd.f32 %v3169_v29, %v4491_v4  ;;  %v2789_v19 = vpop.f32.mrb[27].mxu1 }
 0x3c0   : > { %v2841_v59 = vmax.f32 %v2787_v31, 0.0  ;;  %v2790_v30 = vadd.f32 %v4491_v4, %v2789_v19 }
 0x3c1   : > { %v2844_v27 = vmax.f32 %v2798_v21, 0.0 }
 0x3c2   : > { %v2861_v63 = vmax.f32 %v2841_v59, %v2843_v8  ;;  %v2842_v6 = vmax.f32 %v2790_v30, 0.0 }
 0x3c4   : > { %2877 = vst.msk [vmem:[#allocation2 + $0x60] sm:$0xff] %vm1108_vm7, %v2861_v63  ;;  %v2862_v46 = vmax.f32 %v2842_v6, %v2844_v27 }
 0x3c6   : > { %2878 = vst.msk [vmem:[#allocation2 + $0x68] sm:$0xff] %vm1108_vm7, %v2862_v46 }
 0x3cd   : > { %v2893_v20 = vld [vmem:[#allocation2 + $0x60] ss:$2 sm:$0xff]  ;;  %v2909_v24 = vld [vmem:[#allocation2 + $0x61] ss:$2 sm:$0xff] }
 0x3ce   : > { %v2918_v50 = vmax.f32 %v2893_v20, %v2909_v24 }
 0x3d0   : > { %2926 = vst.msk [vmem:[%s4505_s13 + $0x30] sm:$0xff] %vm1108_vm7, %v2918_v50 }
 0x3df   : > { %v3172_v14 = vpop.f32.mrb[28].mxu1 }
 0x3e0   : > { %v2811_v26 = vadd.f32 %v3172_v14, %v4491_v4  ;;  %v2802_v58 = vpop.f32.mrb[29].mxu1 }
 0x3e1   : > { %v2803_v23 = vadd.f32 %v4491_v4, %v2802_v58  ;;  %v3173_v44 = vpop.f32.mrb[30].mxu1 }
 0x3e2   : > { %v2847_v47 = vmax.f32 %v2811_v26, 0.0  ;;  %v2814_v22 = vadd.f32 %v3173_v44, %v4491_v4  ;;  %v2805_v25 = vpop.f32.mrb[31].mxu1 }
 0x3e3   : > { %v2845_v60 = vmax.f32 %v2803_v23, 0.0  ;;  %v2806_v54 = vadd.f32 %v4491_v4, %v2805_v25 }
 0x3e4   : > { %v2848_v17 = vmax.f32 %v2814_v22, 0.0 }
 0x3e5   : > { %v2863_v12 = vmax.f32 %v2845_v60, %v2847_v47  ;;  %v2846_v3 = vmax.f32 %v2806_v54, 0.0 }
 0x3e7   : > { %2879 = vst.msk [vmem:[#allocation2 + $0x70] sm:$0xff] %vm1108_vm7, %v2863_v12  ;;  %v2864_v33 = vmax.f32 %v2846_v3, %v2848_v17 }
 0x3e9   : > { %2880 = vst.msk [vmem:[#allocation2 + $0x78] sm:$0xff] %vm1108_vm7, %v2864_v33 }
 0x3f0   : > { %v2895_v42 = vld [vmem:[#allocation2 + $0x70] ss:$2 sm:$0xff]  ;;  %v2911_v5 = vld [vmem:[#allocation2 + $0x71] ss:$2 sm:$0xff] }
 0x3f1   : > { %v2919_v52 = vmax.f32 %v2895_v42, %v2911_v5 }
 0x3f3   : > { %2927 = vst.msk [vmem:[%s4505_s13 + $0x38] sm:$0xff] %vm1108_vm7, %v2919_v52 }
 0x3f4 PF: > { %s15_s18 = sadd.s32 1, %s3228_s18  }
 0x3f5   : > { %p12_p4 = scmp.ge.s32.totalorder %s15_s18, 4  }
 0x3f7   :  { %14 = sbr.rel (!%p12_p4) target bundleno = 1 (0x1), region = 85 }

</bundles_post_ra>
